<compile_context>
chip_gen: v6e
topology: v6e:2x2x1
jax: 0.10.0
libtpu: 0.0.40
codegen_flags: <defaults>
</compile_context>

<pallas_src>
import math

import jax
import jax.numpy as jnp
from jax import lax
from jax.experimental import pallas as pl
from jax.experimental.pallas import tpu as pltpu

# ----- small, forward-consistent config (GPT-2 style) -----
HIDDEN = 32          # n_embd
NUM_LAYERS = 2       # n_layer
NUM_HEADS = 4        # n_head
HEAD_DIM = HIDDEN // NUM_HEADS
FFN = 4 * HIDDEN     # 128
MAX_SEQ = 16         # n_positions
VOCAB = 128          # vocab_size
SEQ = 8              # runtime sequence length
BATCH = 2
LN_EPS = 1e-5
NEG_INF = -1e9
GELU_C = math.sqrt(2.0 / math.pi)


# ---------------------------------------------------------------------------
# In-kernel helpers
# ---------------------------------------------------------------------------
def _layer_norm(x, g, b):
    mean = jnp.mean(x, axis=-1, keepdims=True)
    var = jnp.mean((x - mean) ** 2, axis=-1, keepdims=True)
    return (x - mean) * lax.rsqrt(var + LN_EPS) * g + b


def _gelu_new(x):
    # HF GPT-2 "gelu_new": 0.5*x*(1+tanh(sqrt(2/pi)*(x+0.044715*x^3)))
    return 0.5 * x * (1.0 + jnp.tanh(GELU_C * (x + 0.044715 * x * x * x)))


# ---------------------------------------------------------------------------
# Single fused kernel: embeddings-in -> all layers -> ln_f -> tied LM head
# ---------------------------------------------------------------------------
def gpt2_forward_kernel(x_ref, bias_ref, ln_ref, b_ref,
                        wqkv_ref, wo_ref, wfc_ref, wpr_ref, wte_ref,
                        out_ref):
    N, H = x_ref.shape                     # (B*S, HIDDEN)

    x = x_ref[...]                         # f32 residual stream, VMEM-resident
    bias = bias_ref[...]                   # (N, N) additive attention bias

    for li in range(NUM_LAYERS):           # static unrolled layer loop
        ln1 = ln_ref[2 * li]               # (2, H): row 0 gamma, row 1 beta
        ln2 = ln_ref[2 * li + 1]
        bl = b_ref[li]                     # (4, FFN) packed projection biases

        # ---------------- self-attention ----------------
        h = _layer_norm(x, ln1[0:1, :], ln1[1:2, :])

        # fused c_attn: one (N,H)@(H,3H) MXU push; Q pre-scaled by 1/sqrt(hd)
        qkv = jnp.dot(h.astype(jnp.bfloat16), wqkv_ref[li],
                      preferred_element_type=jnp.float32)
        qkv = qkv + bl[0:1, :3 * H]

        # head split: lane slices stacked on a new leading (head) axis
        q = jnp.stack([qkv[:, hh * HEAD_DIM:(hh + 1) * HEAD_DIM]
                       for hh in range(NUM_HEADS)])               # (NH, N, HD)
        k = jnp.stack([qkv[:, H + hh * HEAD_DIM:H + (hh + 1) * HEAD_DIM]
                       for hh in range(NUM_HEADS)])
        v = jnp.stack([qkv[:, 2 * H + hh * HEAD_DIM:2 * H + (hh + 1) * HEAD_DIM]
                       for hh in range(NUM_HEADS)])

        scores = jnp.einsum('hqd,hkd->hqk', q, k,
                            preferred_element_type=jnp.float32)   # (NH, N, N)
        scores = scores + bias[None, :, :]
        scores = scores - jnp.max(scores, axis=-1, keepdims=True)
        p = jnp.exp(scores)
        p = p * pl.reciprocal(jnp.sum(p, axis=-1, keepdims=True), approx=True)

        ctx = jnp.einsum('hqk,hkd->hqd', p, v,
                         preferred_element_type=jnp.float32)      # (NH, N, HD)

        # merge heads back onto the lane axis -> single (N,H)@(H,H) dot
        ctx2d = jnp.concatenate([ctx[hh] for hh in range(NUM_HEADS)], axis=-1)
        attn_out = jnp.dot(ctx2d.astype(jnp.bfloat16), wo_ref[li],
                           preferred_element_type=jnp.float32)
        x = x + attn_out + bl[1:2, :H]

        # ---------------- MLP ----------------
        h2 = _layer_norm(x, ln2[0:1, :], ln2[1:2, :])
        ff = jnp.dot(h2.astype(jnp.bfloat16), wfc_ref[li],
                     preferred_element_type=jnp.float32) + bl[2:3, :]
        ff = _gelu_new(ff)
        ff = jnp.dot(ff.astype(jnp.bfloat16), wpr_ref[li],
                     preferred_element_type=jnp.float32) + bl[3:4, :H]
        x = x + ff

    # ---------------- final LN + tied LM head ----------------
    lnf = ln_ref[2 * NUM_LAYERS]
    hf = _layer_norm(x, lnf[0:1, :], lnf[1:2, :])
    # logits = ln_f(x) @ wte^T  (transposed RHS is free via dot_general)
    logits = lax.dot_general(hf.astype(jnp.bfloat16), wte_ref[...],
                             dimension_numbers=(((1,), (1,)), ((), ())),
                             preferred_element_type=jnp.float32)  # (N, V)
    out_ref[...] = logits                  # lane-dense (N, 128) unmasked store


# ---------------------------------------------------------------------------
# Deterministic parameter init (GPT-2 style: N(0, 0.02), LN gamma=1/beta=0)
# Weights are stacked over layers; small f32 params are packed into slabs.
# ---------------------------------------------------------------------------
def init_params(key):
    def normal(k, shape):
        return 0.02 * jax.random.normal(k, shape, dtype=jnp.float32)

    keys = jax.random.split(key, 2 + NUM_LAYERS)
    wte = normal(keys[0], (VOCAB, HIDDEN))
    wpe = normal(keys[1], (MAX_SEQ, HIDDEN))

    attn_scale = 1.0 / math.sqrt(HEAD_DIM)

    wqkv, wo, wfc, wpr = [], [], [], []
    for li in range(NUM_LAYERS):
        lk = jax.random.split(keys[2 + li], 4)
        w_attn = normal(lk[0], (HIDDEN, 3 * HIDDEN))           # c_attn (Conv1D)
        # fold 1/sqrt(head_dim) into the Q columns once, at init
        w_attn = w_attn.at[:, :HIDDEN].multiply(attn_scale)
        wqkv.append(w_attn)
        wo.append(normal(lk[1], (HIDDEN, HIDDEN)))             # attn c_proj
        wfc.append(normal(lk[2], (HIDDEN, FFN)))               # mlp c_fc
        wpr.append(normal(lk[3], (FFN, HIDDEN)))               # mlp c_proj

    L = NUM_LAYERS
    # LN slab: index 2*l -> ln_1 of layer l, 2*l+1 -> ln_2, last -> ln_f.
    ln = jnp.concatenate([jnp.ones((2 * L + 1, 1, HIDDEN), jnp.float32),
                          jnp.zeros((2 * L + 1, 1, HIDDEN), jnp.float32)],
                         axis=1)                                # (2L+1, 2, H)

    # Projection-bias slab, lane-padded to FFN=128 (HF init: zeros).
    # Row 0: c_attn (3H, Q-part already scale-folded), 1: attn c_proj,
    # row 2: mlp c_fc, 3: mlp c_proj.
    biases = jnp.zeros((L, 4, FFN), jnp.float32)

    return {
        "wte": wte.astype(jnp.bfloat16),                        # tied embed + LM head
        "wpe": wpe,
        "ln": ln,
        "b": biases,
        "wqkv": jnp.stack(wqkv).astype(jnp.bfloat16),           # (L, H, 3H)
        "wo": jnp.stack(wo).astype(jnp.bfloat16),               # (L, H, H)
        "wfc": jnp.stack(wfc).astype(jnp.bfloat16),             # (L, H, FFN)
        "wpr": jnp.stack(wpr).astype(jnp.bfloat16),             # (L, FFN, H)
    }


def _cost_estimate(n_tokens):
    n, h, f, nh, hd, v = n_tokens, HIDDEN, FFN, NUM_HEADS, HEAD_DIM, VOCAB
    per_layer = (2 * n * h * 3 * h          # fused qkv
                 + 2 * nh * n * n * hd      # scores
                 + 2 * nh * n * n * hd      # ctx
                 + 2 * n * h * h            # attn out proj
                 + 2 * n * h * f            # mlp c_fc
                 + 2 * n * f * h)           # mlp c_proj
    flops = NUM_LAYERS * per_layer + 2 * n * h * v
    transcend = NUM_LAYERS * (nh * n * n + n * f) + (2 * NUM_LAYERS + 1) * n
    bytes_in = (n * h * 4 + n * n * 4
                + (2 * NUM_LAYERS + 1) * 2 * h * 4
                + NUM_LAYERS * 4 * f * 4
                + NUM_LAYERS * (h * 3 * h + h * h + h * f + f * h) * 2
                + v * h * 2)
    bytes_out = n * v * 4
    return pl.CostEstimate(flops=flops, transcendentals=transcend,
                           bytes_accessed=bytes_in + bytes_out)


# ---------------------------------------------------------------------------
# Full forward:  logits = GPT2LMHeadModel(input_ids, attention_mask)[0]
# ---------------------------------------------------------------------------
@jax.jit
def gpt_lm_forward(input_ids, attention_mask, params):
    B, S = input_ids.shape
    N = B * S

    # token + position embeddings (plain-JAX glue: data-dependent gather),
    # pre-flattened so the kernel sees a clean (sublane=N, lane=H) slab.
    x = (jnp.take(params["wte"], input_ids, axis=0).astype(jnp.float32)
         + params["wpe"][:S][None, :, :]).reshape(N, HIDDEN)

    # Additive attention bias over the flattened (B*S) axis: causal within a
    # sequence, HF key-padding mask, -inf across batches.
    # TODO(synk): at real sequence lengths keep batch / query tiles as grid
    # axes and build the mask in-kernel instead of a dense (B*S)^2 f32 bias.
    bidx = jnp.arange(N, dtype=jnp.int32) // S
    pos = jnp.arange(N, dtype=jnp.int32) % S
    same_batch = bidx[:, None] == bidx[None, :]
    causal = pos[:, None] >= pos[None, :]
    key_keep = attention_mask.reshape(N).astype(bool)
    allowed = same_batch & causal & key_keep[None, :]
    bias = jnp.where(allowed, 0.0, NEG_INF).astype(jnp.float32)  # (N, N)

    logits = pl.pallas_call(
        gpt2_forward_kernel,
        out_shape=jax.ShapeDtypeStruct((N, VOCAB), jnp.float32),
        compiler_params=pltpu.CompilerParams(
            vmem_limit_bytes=32 * 1024 * 1024),
        cost_estimate=_cost_estimate(N),
    )(x, bias, params["ln"], params["b"],
      params["wqkv"], params["wo"], params["wfc"], params["wpr"],
      params["wte"])

    return logits.reshape(B, S, VOCAB)


if __name__ == "__main__":
    key = jax.random.PRNGKey(0)
    pkey, ikey = jax.random.split(key)
    params = init_params(pkey)

    input_ids = jax.random.randint(ikey, (BATCH, SEQ), 0, VOCAB, dtype=jnp.int32)
    attention_mask = jnp.ones((BATCH, SEQ), dtype=jnp.int32)

    logits = gpt_lm_forward(input_ids, attention_mask, params)
    logits = jax.block_until_ready(logits)

    assert logits.shape == (BATCH, SEQ, VOCAB)
    assert bool(jnp.all(jnp.isfinite(logits)))
    print("KERNEL_OK")
</pallas_src>

<mosaic_0001>
module attributes {stable_mosaic.version = 11 : i64} {
  func.func @gpt2_forward_kernel(%arg0: memref<16x32xf32, #tpu.memory_space<vmem>>, %arg1: memref<16x16xf32, #tpu.memory_space<vmem>>, %arg2: memref<5x2x32xf32, #tpu.memory_space<vmem>>, %arg3: memref<2x4x128xf32, #tpu.memory_space<vmem>>, %arg4: memref<2x32x96xbf16, #tpu.memory_space<vmem>>, %arg5: memref<2x32x32xbf16, #tpu.memory_space<vmem>>, %arg6: memref<2x32x128xbf16, #tpu.memory_space<vmem>>, %arg7: memref<2x128x32xbf16, #tpu.memory_space<vmem>>, %arg8: memref<128x32xbf16, #tpu.memory_space<vmem>>, %arg9: memref<16x128xf32, #tpu.memory_space<vmem>>) attributes {dimension_semantics = [], scalar_prefetch = 0 : i64, scratch_operands = 0 : i64, tpu.core_type = #tpu.core_type<tc>} {
    %c0 = arith.constant 0 : index
    %c0_0 = arith.constant 0 : index
    %0 = vector.load %arg0[%c0, %c0_0] : memref<16x32xf32, #tpu.memory_space<vmem>>, vector<16x32xf32>
    %c0_1 = arith.constant 0 : index
    %c0_2 = arith.constant 0 : index
    %1 = vector.load %arg1[%c0_1, %c0_2] : memref<16x16xf32, #tpu.memory_space<vmem>>, vector<16x16xf32>
    %c0_3 = arith.constant 0 : index
    %c0_4 = arith.constant 0 : index
    %c0_5 = arith.constant 0 : index
    %2 = vector.load %arg2[%c0_3, %c0_4, %c0_5] : memref<5x2x32xf32, #tpu.memory_space<vmem>>, vector<1x2x32xf32>
    %3 = vector.shape_cast %2 : vector<1x2x32xf32> to vector<2x32xf32>
    %c1 = arith.constant 1 : index
    %c0_6 = arith.constant 0 : index
    %c0_7 = arith.constant 0 : index
    %4 = vector.load %arg2[%c1, %c0_6, %c0_7] : memref<5x2x32xf32, #tpu.memory_space<vmem>>, vector<1x2x32xf32>
    %5 = vector.shape_cast %4 : vector<1x2x32xf32> to vector<2x32xf32>
    %c0_8 = arith.constant 0 : index
    %c0_9 = arith.constant 0 : index
    %c0_10 = arith.constant 0 : index
    %6 = vector.load %arg3[%c0_8, %c0_9, %c0_10] : memref<2x4x128xf32, #tpu.memory_space<vmem>>, vector<1x4x128xf32>
    %7 = vector.shape_cast %6 : vector<1x4x128xf32> to vector<4x128xf32>
    %8 = vector.extract_strided_slice %3 {offsets = [0, 0], sizes = [1, 32], strides = [1, 1]} : vector<2x32xf32> to vector<1x32xf32>
    %9 = vector.extract_strided_slice %3 {offsets = [1, 0], sizes = [1, 32], strides = [1, 1]} : vector<2x32xf32> to vector<1x32xf32>
    %cst = arith.constant dense<0.000000e+00> : vector<16xf32>
    %10 = vector.multi_reduction <add>, %0, %cst [1] : vector<16x32xf32> to vector<16xf32>
    %11 = vector.shape_cast %10 : vector<16xf32> to vector<16x1xf32>
    %cst_11 = arith.constant 3.200000e+01 : f32
    %12 = vector.broadcast %cst_11 : f32 to vector<16x1xf32>
    %13 = arith.divf %11, %12 : vector<16x1xf32>
    %14 = vector.broadcast %13 : vector<16x1xf32> to vector<16x32xf32>
    %15 = arith.subf %0, %14 : vector<16x32xf32>
    %16 = arith.mulf %15, %15 : vector<16x32xf32>
    %cst_12 = arith.constant dense<0.000000e+00> : vector<16xf32>
    %17 = vector.multi_reduction <add>, %16, %cst_12 [1] : vector<16x32xf32> to vector<16xf32>
    %18 = vector.shape_cast %17 : vector<16xf32> to vector<16x1xf32>
    %cst_13 = arith.constant 3.200000e+01 : f32
    %19 = vector.broadcast %cst_13 : f32 to vector<16x1xf32>
    %20 = arith.divf %18, %19 : vector<16x1xf32>
    %21 = vector.broadcast %13 : vector<16x1xf32> to vector<16x32xf32>
    %22 = arith.subf %0, %21 : vector<16x32xf32>
    %cst_14 = arith.constant 9.99999974E-6 : f32
    %23 = vector.broadcast %cst_14 : f32 to vector<16x1xf32>
    %24 = arith.addf %20, %23 : vector<16x1xf32>
    %25 = math.rsqrt %24 : vector<16x1xf32>
    %26 = vector.broadcast %25 : vector<16x1xf32> to vector<16x32xf32>
    %27 = arith.mulf %22, %26 : vector<16x32xf32>
    %28 = vector.broadcast %8 : vector<1x32xf32> to vector<16x32xf32>
    %29 = arith.mulf %27, %28 : vector<16x32xf32>
    %30 = vector.broadcast %9 : vector<1x32xf32> to vector<16x32xf32>
    %31 = arith.addf %29, %30 : vector<16x32xf32>
    %32 = arith.truncf %31 : vector<16x32xf32> to vector<16x32xbf16>
    %c0_15 = arith.constant 0 : index
    %c0_16 = arith.constant 0 : index
    %c0_17 = arith.constant 0 : index
    %33 = vector.load %arg4[%c0_15, %c0_16, %c0_17] : memref<2x32x96xbf16, #tpu.memory_space<vmem>>, vector<1x32x96xbf16>
    %34 = vector.shape_cast %33 : vector<1x32x96xbf16> to vector<32x96xbf16>
    %cst_18 = arith.constant dense<0.000000e+00> : vector<16x96xf32>
    %35 = tpu.matmul %32, %34, %cst_18 {dimension_numbers = #tpu.dot_dimension_numbers<[1], [0], [0], [1], [0, 0, 1, 1], [], []>} : vector<16x32xbf16>, vector<32x96xbf16>, vector<16x96xf32> -> vector<16x96xf32>
    %36 = vector.extract_strided_slice %7 {offsets = [0, 0], sizes = [1, 96], strides = [1, 1]} : vector<4x128xf32> to vector<1x96xf32>
    %37 = vector.broadcast %36 : vector<1x96xf32> to vector<16x96xf32>
    %38 = arith.addf %35, %37 : vector<16x96xf32>
    %39 = vector.extract_strided_slice %38 {offsets = [0, 0], sizes = [16, 8], strides = [1, 1]} : vector<16x96xf32> to vector<16x8xf32>
    %40 = vector.extract_strided_slice %38 {offsets = [0, 8], sizes = [16, 8], strides = [1, 1]} : vector<16x96xf32> to vector<16x8xf32>
    %41 = vector.extract_strided_slice %38 {offsets = [0, 16], sizes = [16, 8], strides = [1, 1]} : vector<16x96xf32> to vector<16x8xf32>
    %42 = vector.extract_strided_slice %38 {offsets = [0, 24], sizes = [16, 8], strides = [1, 1]} : vector<16x96xf32> to vector<16x8xf32>
    %43 = vector.shape_cast %39 : vector<16x8xf32> to vector<1x16x8xf32>
    %44 = vector.shape_cast %40 : vector<16x8xf32> to vector<1x16x8xf32>
    %45 = vector.shape_cast %41 : vector<16x8xf32> to vector<1x16x8xf32>
    %46 = vector.shape_cast %42 : vector<16x8xf32> to vector<1x16x8xf32>
    %47 = tpu.concatenate %43, %44, %45, %46 in 0 : vector<1x16x8xf32>, vector<1x16x8xf32>, vector<1x16x8xf32>, vector<1x16x8xf32> -> vector<4x16x8xf32>
    %48 = vector.extract_strided_slice %38 {offsets = [0, 32], sizes = [16, 8], strides = [1, 1]} : vector<16x96xf32> to vector<16x8xf32>
    %49 = vector.extract_strided_slice %38 {offsets = [0, 40], sizes = [16, 8], strides = [1, 1]} : vector<16x96xf32> to vector<16x8xf32>
    %50 = vector.extract_strided_slice %38 {offsets = [0, 48], sizes = [16, 8], strides = [1, 1]} : vector<16x96xf32> to vector<16x8xf32>
    %51 = vector.extract_strided_slice %38 {offsets = [0, 56], sizes = [16, 8], strides = [1, 1]} : vector<16x96xf32> to vector<16x8xf32>
    %52 = vector.shape_cast %48 : vector<16x8xf32> to vector<1x16x8xf32>
    %53 = vector.shape_cast %49 : vector<16x8xf32> to vector<1x16x8xf32>
    %54 = vector.shape_cast %50 : vector<16x8xf32> to vector<1x16x8xf32>
    %55 = vector.shape_cast %51 : vector<16x8xf32> to vector<1x16x8xf32>
    %56 = tpu.concatenate %52, %53, %54, %55 in 0 : vector<1x16x8xf32>, vector<1x16x8xf32>, vector<1x16x8xf32>, vector<1x16x8xf32> -> vector<4x16x8xf32>
    %57 = vector.extract_strided_slice %38 {offsets = [0, 64], sizes = [16, 8], strides = [1, 1]} : vector<16x96xf32> to vector<16x8xf32>
    %58 = vector.extract_strided_slice %38 {offsets = [0, 72], sizes = [16, 8], strides = [1, 1]} : vector<16x96xf32> to vector<16x8xf32>
    %59 = vector.extract_strided_slice %38 {offsets = [0, 80], sizes = [16, 8], strides = [1, 1]} : vector<16x96xf32> to vector<16x8xf32>
    %60 = vector.extract_strided_slice %38 {offsets = [0, 88], sizes = [16, 8], strides = [1, 1]} : vector<16x96xf32> to vector<16x8xf32>
    %61 = vector.shape_cast %57 : vector<16x8xf32> to vector<1x16x8xf32>
    %62 = vector.shape_cast %58 : vector<16x8xf32> to vector<1x16x8xf32>
    %63 = vector.shape_cast %59 : vector<16x8xf32> to vector<1x16x8xf32>
    %64 = vector.shape_cast %60 : vector<16x8xf32> to vector<1x16x8xf32>
    %65 = tpu.concatenate %61, %62, %63, %64 in 0 : vector<1x16x8xf32>, vector<1x16x8xf32>, vector<1x16x8xf32>, vector<1x16x8xf32> -> vector<4x16x8xf32>
    "tpu.trace_start"() <{level = 10 : i32, message = "hqd,hkd->hqk"}> : () -> ()
    %cst_19 = arith.constant dense<0.000000e+00> : vector<4x16x16xf32>
    %66 = tpu.matmul %47, %56, %cst_19 {dimension_numbers = #tpu.dot_dimension_numbers<[2], [2], [1], [1], [0, 0, 0, 1, 1, 1], [0], [0]>} : vector<4x16x8xf32>, vector<4x16x8xf32>, vector<4x16x16xf32> -> vector<4x16x16xf32>
    "tpu.trace_stop"() : () -> ()
    %67 = vector.shape_cast %1 : vector<16x16xf32> to vector<1x16x16xf32>
    %68 = vector.broadcast %67 : vector<1x16x16xf32> to vector<4x16x16xf32>
    %69 = arith.addf %66, %68 : vector<4x16x16xf32>
    %cst_20 = arith.constant dense<0xFF800000> : vector<4x16xf32>
    %70 = vector.multi_reduction <maximumf>, %69, %cst_20 [2] : vector<4x16x16xf32> to vector<4x16xf32>
    %71 = vector.shape_cast %70 : vector<4x16xf32> to vector<4x16x1xf32>
    %72 = vector.broadcast %71 : vector<4x16x1xf32> to vector<4x16x16xf32>
    %73 = arith.subf %69, %72 : vector<4x16x16xf32>
    %74 = math.exp %73 : vector<4x16x16xf32>
    %cst_21 = arith.constant dense<0.000000e+00> : vector<4x16xf32>
    %75 = vector.multi_reduction <add>, %74, %cst_21 [2] : vector<4x16x16xf32> to vector<4x16xf32>
    %76 = vector.shape_cast %75 : vector<4x16xf32> to vector<4x16x1xf32>
    %77 = tpu.reciprocal %76 {approx = true} : vector<4x16x1xf32> -> vector<4x16x1xf32>
    %78 = vector.broadcast %77 : vector<4x16x1xf32> to vector<4x16x16xf32>
    %79 = arith.mulf %74, %78 : vector<4x16x16xf32>
    "tpu.trace_start"() <{level = 10 : i32, message = "hqk,hkd->hqd"}> : () -> ()
    %cst_22 = arith.constant dense<0.000000e+00> : vector<4x16x8xf32>
    %80 = tpu.matmul %79, %65, %cst_22 {dimension_numbers = #tpu.dot_dimension_numbers<[2], [1], [1], [2], [0, 0, 0, 1, 1, 2], [0], [0]>} : vector<4x16x16xf32>, vector<4x16x8xf32>, vector<4x16x8xf32> -> vector<4x16x8xf32>
    "tpu.trace_stop"() : () -> ()
    %81 = vector.extract_strided_slice %80 {offsets = [0, 0, 0], sizes = [1, 16, 8], strides = [1, 1, 1]} : vector<4x16x8xf32> to vector<1x16x8xf32>
    %82 = vector.shape_cast %81 : vector<1x16x8xf32> to vector<16x8xf32>
    %83 = vector.extract_strided_slice %80 {offsets = [1, 0, 0], sizes = [1, 16, 8], strides = [1, 1, 1]} : vector<4x16x8xf32> to vector<1x16x8xf32>
    %84 = vector.shape_cast %83 : vector<1x16x8xf32> to vector<16x8xf32>
    %85 = vector.extract_strided_slice %80 {offsets = [2, 0, 0], sizes = [1, 16, 8], strides = [1, 1, 1]} : vector<4x16x8xf32> to vector<1x16x8xf32>
    %86 = vector.shape_cast %85 : vector<1x16x8xf32> to vector<16x8xf32>
    %87 = vector.extract_strided_slice %80 {offsets = [3, 0, 0], sizes = [1, 16, 8], strides = [1, 1, 1]} : vector<4x16x8xf32> to vector<1x16x8xf32>
    %88 = vector.shape_cast %87 : vector<1x16x8xf32> to vector<16x8xf32>
    %89 = tpu.concatenate %82, %84, %86, %88 in 1 : vector<16x8xf32>, vector<16x8xf32>, vector<16x8xf32>, vector<16x8xf32> -> vector<16x32xf32>
    %90 = arith.truncf %89 : vector<16x32xf32> to vector<16x32xbf16>
    %c0_23 = arith.constant 0 : index
    %c0_24 = arith.constant 0 : index
    %c0_25 = arith.constant 0 : index
    %91 = vector.load %arg5[%c0_23, %c0_24, %c0_25] : memref<2x32x32xbf16, #tpu.memory_space<vmem>>, vector<1x32x32xbf16>
    %92 = vector.shape_cast %91 : vector<1x32x32xbf16> to vector<32x32xbf16>
    %cst_26 = arith.constant dense<0.000000e+00> : vector<16x32xf32>
    %93 = tpu.matmul %90, %92, %cst_26 {dimension_numbers = #tpu.dot_dimension_numbers<[1], [0], [0], [1], [0, 0, 1, 1], [], []>} : vector<16x32xbf16>, vector<32x32xbf16>, vector<16x32xf32> -> vector<16x32xf32>
    %94 = arith.addf %0, %93 : vector<16x32xf32>
    %95 = vector.extract_strided_slice %7 {offsets = [1, 0], sizes = [1, 32], strides = [1, 1]} : vector<4x128xf32> to vector<1x32xf32>
    %96 = vector.broadcast %95 : vector<1x32xf32> to vector<16x32xf32>
    %97 = arith.addf %94, %96 : vector<16x32xf32>
    %98 = vector.extract_strided_slice %5 {offsets = [0, 0], sizes = [1, 32], strides = [1, 1]} : vector<2x32xf32> to vector<1x32xf32>
    %99 = vector.extract_strided_slice %5 {offsets = [1, 0], sizes = [1, 32], strides = [1, 1]} : vector<2x32xf32> to vector<1x32xf32>
    %cst_27 = arith.constant dense<0.000000e+00> : vector<16xf32>
    %100 = vector.multi_reduction <add>, %97, %cst_27 [1] : vector<16x32xf32> to vector<16xf32>
    %101 = vector.shape_cast %100 : vector<16xf32> to vector<16x1xf32>
    %cst_28 = arith.constant 3.200000e+01 : f32
    %102 = vector.broadcast %cst_28 : f32 to vector<16x1xf32>
    %103 = arith.divf %101, %102 : vector<16x1xf32>
    %104 = vector.broadcast %103 : vector<16x1xf32> to vector<16x32xf32>
    %105 = arith.subf %97, %104 : vector<16x32xf32>
    %106 = arith.mulf %105, %105 : vector<16x32xf32>
    %cst_29 = arith.constant dense<0.000000e+00> : vector<16xf32>
    %107 = vector.multi_reduction <add>, %106, %cst_29 [1] : vector<16x32xf32> to vector<16xf32>
    %108 = vector.shape_cast %107 : vector<16xf32> to vector<16x1xf32>
    %cst_30 = arith.constant 3.200000e+01 : f32
    %109 = vector.broadcast %cst_30 : f32 to vector<16x1xf32>
    %110 = arith.divf %108, %109 : vector<16x1xf32>
    %111 = vector.broadcast %103 : vector<16x1xf32> to vector<16x32xf32>
    %112 = arith.subf %97, %111 : vector<16x32xf32>
    %cst_31 = arith.constant 9.99999974E-6 : f32
    %113 = vector.broadcast %cst_31 : f32 to vector<16x1xf32>
    %114 = arith.addf %110, %113 : vector<16x1xf32>
    %115 = math.rsqrt %114 : vector<16x1xf32>
    %116 = vector.broadcast %115 : vector<16x1xf32> to vector<16x32xf32>
    %117 = arith.mulf %112, %116 : vector<16x32xf32>
    %118 = vector.broadcast %98 : vector<1x32xf32> to vector<16x32xf32>
    %119 = arith.mulf %117, %118 : vector<16x32xf32>
    %120 = vector.broadcast %99 : vector<1x32xf32> to vector<16x32xf32>
    %121 = arith.addf %119, %120 : vector<16x32xf32>
    %122 = arith.truncf %121 : vector<16x32xf32> to vector<16x32xbf16>
    %c0_32 = arith.constant 0 : index
    %c0_33 = arith.constant 0 : index
    %c0_34 = arith.constant 0 : index
    %123 = vector.load %arg6[%c0_32, %c0_33, %c0_34] : memref<2x32x128xbf16, #tpu.memory_space<vmem>>, vector<1x32x128xbf16>
    %124 = vector.shape_cast %123 : vector<1x32x128xbf16> to vector<32x128xbf16>
    %cst_35 = arith.constant dense<0.000000e+00> : vector<16x128xf32>
    %125 = tpu.matmul %122, %124, %cst_35 {dimension_numbers = #tpu.dot_dimension_numbers<[1], [0], [0], [1], [0, 0, 1, 1], [], []>} : vector<16x32xbf16>, vector<32x128xbf16>, vector<16x128xf32> -> vector<16x128xf32>
    %126 = vector.extract_strided_slice %7 {offsets = [2, 0], sizes = [1, 128], strides = [1, 1]} : vector<4x128xf32> to vector<1x128xf32>
    %127 = vector.broadcast %126 : vector<1x128xf32> to vector<16x128xf32>
    %128 = arith.addf %125, %127 : vector<16x128xf32>
    %cst_36 = arith.constant 5.000000e-01 : f32
    %129 = vector.broadcast %cst_36 : f32 to vector<16x128xf32>
    %130 = arith.mulf %129, %128 : vector<16x128xf32>
    %cst_37 = arith.constant 4.471500e-02 : f32
    %131 = vector.broadcast %cst_37 : f32 to vector<16x128xf32>
    %132 = arith.mulf %131, %128 : vector<16x128xf32>
    %133 = arith.mulf %132, %128 : vector<16x128xf32>
    %134 = arith.mulf %133, %128 : vector<16x128xf32>
    %135 = arith.addf %128, %134 : vector<16x128xf32>
    %cst_38 = arith.constant 0.797884583 : f32
    %136 = vector.broadcast %cst_38 : f32 to vector<16x128xf32>
    %137 = arith.mulf %136, %135 : vector<16x128xf32>
    %138 = math.tanh %137 : vector<16x128xf32>
    %cst_39 = arith.constant 1.000000e+00 : f32
    %139 = vector.broadcast %cst_39 : f32 to vector<16x128xf32>
    %140 = arith.addf %139, %138 : vector<16x128xf32>
    %141 = arith.mulf %130, %140 : vector<16x128xf32>
    %142 = arith.truncf %141 : vector<16x128xf32> to vector<16x128xbf16>
    %c0_40 = arith.constant 0 : index
    %c0_41 = arith.constant 0 : index
    %c0_42 = arith.constant 0 : index
    %143 = vector.load %arg7[%c0_40, %c0_41, %c0_42] : memref<2x128x32xbf16, #tpu.memory_space<vmem>>, vector<1x128x32xbf16>
    %144 = vector.shape_cast %143 : vector<1x128x32xbf16> to vector<128x32xbf16>
    %cst_43 = arith.constant dense<0.000000e+00> : vector<16x32xf32>
    %145 = tpu.matmul %142, %144, %cst_43 {dimension_numbers = #tpu.dot_dimension_numbers<[1], [0], [0], [1], [0, 0, 1, 1], [], []>} : vector<16x128xbf16>, vector<128x32xbf16>, vector<16x32xf32> -> vector<16x32xf32>
    %146 = vector.extract_strided_slice %7 {offsets = [3, 0], sizes = [1, 32], strides = [1, 1]} : vector<4x128xf32> to vector<1x32xf32>
    %147 = vector.broadcast %146 : vector<1x32xf32> to vector<16x32xf32>
    %148 = arith.addf %145, %147 : vector<16x32xf32>
    %149 = arith.addf %97, %148 : vector<16x32xf32>
    %c2 = arith.constant 2 : index
    %c0_44 = arith.constant 0 : index
    %c0_45 = arith.constant 0 : index
    %150 = vector.load %arg2[%c2, %c0_44, %c0_45] : memref<5x2x32xf32, #tpu.memory_space<vmem>>, vector<1x2x32xf32>
    %151 = vector.shape_cast %150 : vector<1x2x32xf32> to vector<2x32xf32>
    %c3 = arith.constant 3 : index
    %c0_46 = arith.constant 0 : index
    %c0_47 = arith.constant 0 : index
    %152 = vector.load %arg2[%c3, %c0_46, %c0_47] : memref<5x2x32xf32, #tpu.memory_space<vmem>>, vector<1x2x32xf32>
    %153 = vector.shape_cast %152 : vector<1x2x32xf32> to vector<2x32xf32>
    %c1_48 = arith.constant 1 : index
    %c0_49 = arith.constant 0 : index
    %c0_50 = arith.constant 0 : index
    %154 = vector.load %arg3[%c1_48, %c0_49, %c0_50] : memref<2x4x128xf32, #tpu.memory_space<vmem>>, vector<1x4x128xf32>
    %155 = vector.shape_cast %154 : vector<1x4x128xf32> to vector<4x128xf32>
    %156 = vector.extract_strided_slice %151 {offsets = [0, 0], sizes = [1, 32], strides = [1, 1]} : vector<2x32xf32> to vector<1x32xf32>
    %157 = vector.extract_strided_slice %151 {offsets = [1, 0], sizes = [1, 32], strides = [1, 1]} : vector<2x32xf32> to vector<1x32xf32>
    %cst_51 = arith.constant dense<0.000000e+00> : vector<16xf32>
    %158 = vector.multi_reduction <add>, %149, %cst_51 [1] : vector<16x32xf32> to vector<16xf32>
    %159 = vector.shape_cast %158 : vector<16xf32> to vector<16x1xf32>
    %cst_52 = arith.constant 3.200000e+01 : f32
    %160 = vector.broadcast %cst_52 : f32 to vector<16x1xf32>
    %161 = arith.divf %159, %160 : vector<16x1xf32>
    %162 = vector.broadcast %161 : vector<16x1xf32> to vector<16x32xf32>
    %163 = arith.subf %149, %162 : vector<16x32xf32>
    %164 = arith.mulf %163, %163 : vector<16x32xf32>
    %cst_53 = arith.constant dense<0.000000e+00> : vector<16xf32>
    %165 = vector.multi_reduction <add>, %164, %cst_53 [1] : vector<16x32xf32> to vector<16xf32>
    %166 = vector.shape_cast %165 : vector<16xf32> to vector<16x1xf32>
    %cst_54 = arith.constant 3.200000e+01 : f32
    %167 = vector.broadcast %cst_54 : f32 to vector<16x1xf32>
    %168 = arith.divf %166, %167 : vector<16x1xf32>
    %169 = vector.broadcast %161 : vector<16x1xf32> to vector<16x32xf32>
    %170 = arith.subf %149, %169 : vector<16x32xf32>
    %cst_55 = arith.constant 9.99999974E-6 : f32
    %171 = vector.broadcast %cst_55 : f32 to vector<16x1xf32>
    %172 = arith.addf %168, %171 : vector<16x1xf32>
    %173 = math.rsqrt %172 : vector<16x1xf32>
    %174 = vector.broadcast %173 : vector<16x1xf32> to vector<16x32xf32>
    %175 = arith.mulf %170, %174 : vector<16x32xf32>
    %176 = vector.broadcast %156 : vector<1x32xf32> to vector<16x32xf32>
    %177 = arith.mulf %175, %176 : vector<16x32xf32>
    %178 = vector.broadcast %157 : vector<1x32xf32> to vector<16x32xf32>
    %179 = arith.addf %177, %178 : vector<16x32xf32>
    %180 = arith.truncf %179 : vector<16x32xf32> to vector<16x32xbf16>
    %c1_56 = arith.constant 1 : index
    %c0_57 = arith.constant 0 : index
    %c0_58 = arith.constant 0 : index
    %181 = vector.load %arg4[%c1_56, %c0_57, %c0_58] : memref<2x32x96xbf16, #tpu.memory_space<vmem>>, vector<1x32x96xbf16>
    %182 = vector.shape_cast %181 : vector<1x32x96xbf16> to vector<32x96xbf16>
    %cst_59 = arith.constant dense<0.000000e+00> : vector<16x96xf32>
    %183 = tpu.matmul %180, %182, %cst_59 {dimension_numbers = #tpu.dot_dimension_numbers<[1], [0], [0], [1], [0, 0, 1, 1], [], []>} : vector<16x32xbf16>, vector<32x96xbf16>, vector<16x96xf32> -> vector<16x96xf32>
    %184 = vector.extract_strided_slice %155 {offsets = [0, 0], sizes = [1, 96], strides = [1, 1]} : vector<4x128xf32> to vector<1x96xf32>
    %185 = vector.broadcast %184 : vector<1x96xf32> to vector<16x96xf32>
    %186 = arith.addf %183, %185 : vector<16x96xf32>
    %187 = vector.extract_strided_slice %186 {offsets = [0, 0], sizes = [16, 8], strides = [1, 1]} : vector<16x96xf32> to vector<16x8xf32>
    %188 = vector.extract_strided_slice %186 {offsets = [0, 8], sizes = [16, 8], strides = [1, 1]} : vector<16x96xf32> to vector<16x8xf32>
    %189 = vector.extract_strided_slice %186 {offsets = [0, 16], sizes = [16, 8], strides = [1, 1]} : vector<16x96xf32> to vector<16x8xf32>
    %190 = vector.extract_strided_slice %186 {offsets = [0, 24], sizes = [16, 8], strides = [1, 1]} : vector<16x96xf32> to vector<16x8xf32>
    %191 = vector.shape_cast %187 : vector<16x8xf32> to vector<1x16x8xf32>
    %192 = vector.shape_cast %188 : vector<16x8xf32> to vector<1x16x8xf32>
    %193 = vector.shape_cast %189 : vector<16x8xf32> to vector<1x16x8xf32>
    %194 = vector.shape_cast %190 : vector<16x8xf32> to vector<1x16x8xf32>
    %195 = tpu.concatenate %191, %192, %193, %194 in 0 : vector<1x16x8xf32>, vector<1x16x8xf32>, vector<1x16x8xf32>, vector<1x16x8xf32> -> vector<4x16x8xf32>
    %196 = vector.extract_strided_slice %186 {offsets = [0, 32], sizes = [16, 8], strides = [1, 1]} : vector<16x96xf32> to vector<16x8xf32>
    %197 = vector.extract_strided_slice %186 {offsets = [0, 40], sizes = [16, 8], strides = [1, 1]} : vector<16x96xf32> to vector<16x8xf32>
    %198 = vector.extract_strided_slice %186 {offsets = [0, 48], sizes = [16, 8], strides = [1, 1]} : vector<16x96xf32> to vector<16x8xf32>
    %199 = vector.extract_strided_slice %186 {offsets = [0, 56], sizes = [16, 8], strides = [1, 1]} : vector<16x96xf32> to vector<16x8xf32>
    %200 = vector.shape_cast %196 : vector<16x8xf32> to vector<1x16x8xf32>
    %201 = vector.shape_cast %197 : vector<16x8xf32> to vector<1x16x8xf32>
    %202 = vector.shape_cast %198 : vector<16x8xf32> to vector<1x16x8xf32>
    %203 = vector.shape_cast %199 : vector<16x8xf32> to vector<1x16x8xf32>
    %204 = tpu.concatenate %200, %201, %202, %203 in 0 : vector<1x16x8xf32>, vector<1x16x8xf32>, vector<1x16x8xf32>, vector<1x16x8xf32> -> vector<4x16x8xf32>
    %205 = vector.extract_strided_slice %186 {offsets = [0, 64], sizes = [16, 8], strides = [1, 1]} : vector<16x96xf32> to vector<16x8xf32>
    %206 = vector.extract_strided_slice %186 {offsets = [0, 72], sizes = [16, 8], strides = [1, 1]} : vector<16x96xf32> to vector<16x8xf32>
    %207 = vector.extract_strided_slice %186 {offsets = [0, 80], sizes = [16, 8], strides = [1, 1]} : vector<16x96xf32> to vector<16x8xf32>
    %208 = vector.extract_strided_slice %186 {offsets = [0, 88], sizes = [16, 8], strides = [1, 1]} : vector<16x96xf32> to vector<16x8xf32>
    %209 = vector.shape_cast %205 : vector<16x8xf32> to vector<1x16x8xf32>
    %210 = vector.shape_cast %206 : vector<16x8xf32> to vector<1x16x8xf32>
    %211 = vector.shape_cast %207 : vector<16x8xf32> to vector<1x16x8xf32>
    %212 = vector.shape_cast %208 : vector<16x8xf32> to vector<1x16x8xf32>
    %213 = tpu.concatenate %209, %210, %211, %212 in 0 : vector<1x16x8xf32>, vector<1x16x8xf32>, vector<1x16x8xf32>, vector<1x16x8xf32> -> vector<4x16x8xf32>
    "tpu.trace_start"() <{level = 10 : i32, message = "hqd,hkd->hqk"}> : () -> ()
    %cst_60 = arith.constant dense<0.000000e+00> : vector<4x16x16xf32>
    %214 = tpu.matmul %195, %204, %cst_60 {dimension_numbers = #tpu.dot_dimension_numbers<[2], [2], [1], [1], [0, 0, 0, 1, 1, 1], [0], [0]>} : vector<4x16x8xf32>, vector<4x16x8xf32>, vector<4x16x16xf32> -> vector<4x16x16xf32>
    "tpu.trace_stop"() : () -> ()
    %215 = vector.shape_cast %1 : vector<16x16xf32> to vector<1x16x16xf32>
    %216 = vector.broadcast %215 : vector<1x16x16xf32> to vector<4x16x16xf32>
    %217 = arith.addf %214, %216 : vector<4x16x16xf32>
    %cst_61 = arith.constant dense<0xFF800000> : vector<4x16xf32>
    %218 = vector.multi_reduction <maximumf>, %217, %cst_61 [2] : vector<4x16x16xf32> to vector<4x16xf32>
    %219 = vector.shape_cast %218 : vector<4x16xf32> to vector<4x16x1xf32>
    %220 = vector.broadcast %219 : vector<4x16x1xf32> to vector<4x16x16xf32>
    %221 = arith.subf %217, %220 : vector<4x16x16xf32>
    %222 = math.exp %221 : vector<4x16x16xf32>
    %cst_62 = arith.constant dense<0.000000e+00> : vector<4x16xf32>
    %223 = vector.multi_reduction <add>, %222, %cst_62 [2] : vector<4x16x16xf32> to vector<4x16xf32>
    %224 = vector.shape_cast %223 : vector<4x16xf32> to vector<4x16x1xf32>
    %225 = tpu.reciprocal %224 {approx = true} : vector<4x16x1xf32> -> vector<4x16x1xf32>
    %226 = vector.broadcast %225 : vector<4x16x1xf32> to vector<4x16x16xf32>
    %227 = arith.mulf %222, %226 : vector<4x16x16xf32>
    "tpu.trace_start"() <{level = 10 : i32, message = "hqk,hkd->hqd"}> : () -> ()
    %cst_63 = arith.constant dense<0.000000e+00> : vector<4x16x8xf32>
    %228 = tpu.matmul %227, %213, %cst_63 {dimension_numbers = #tpu.dot_dimension_numbers<[2], [1], [1], [2], [0, 0, 0, 1, 1, 2], [0], [0]>} : vector<4x16x16xf32>, vector<4x16x8xf32>, vector<4x16x8xf32> -> vector<4x16x8xf32>
    "tpu.trace_stop"() : () -> ()
    %229 = vector.extract_strided_slice %228 {offsets = [0, 0, 0], sizes = [1, 16, 8], strides = [1, 1, 1]} : vector<4x16x8xf32> to vector<1x16x8xf32>
    %230 = vector.shape_cast %229 : vector<1x16x8xf32> to vector<16x8xf32>
    %231 = vector.extract_strided_slice %228 {offsets = [1, 0, 0], sizes = [1, 16, 8], strides = [1, 1, 1]} : vector<4x16x8xf32> to vector<1x16x8xf32>
    %232 = vector.shape_cast %231 : vector<1x16x8xf32> to vector<16x8xf32>
    %233 = vector.extract_strided_slice %228 {offsets = [2, 0, 0], sizes = [1, 16, 8], strides = [1, 1, 1]} : vector<4x16x8xf32> to vector<1x16x8xf32>
    %234 = vector.shape_cast %233 : vector<1x16x8xf32> to vector<16x8xf32>
    %235 = vector.extract_strided_slice %228 {offsets = [3, 0, 0], sizes = [1, 16, 8], strides = [1, 1, 1]} : vector<4x16x8xf32> to vector<1x16x8xf32>
    %236 = vector.shape_cast %235 : vector<1x16x8xf32> to vector<16x8xf32>
    %237 = tpu.concatenate %230, %232, %234, %236 in 1 : vector<16x8xf32>, vector<16x8xf32>, vector<16x8xf32>, vector<16x8xf32> -> vector<16x32xf32>
    %238 = arith.truncf %237 : vector<16x32xf32> to vector<16x32xbf16>
    %c1_64 = arith.constant 1 : index
    %c0_65 = arith.constant 0 : index
    %c0_66 = arith.constant 0 : index
    %239 = vector.load %arg5[%c1_64, %c0_65, %c0_66] : memref<2x32x32xbf16, #tpu.memory_space<vmem>>, vector<1x32x32xbf16>
    %240 = vector.shape_cast %239 : vector<1x32x32xbf16> to vector<32x32xbf16>
    %cst_67 = arith.constant dense<0.000000e+00> : vector<16x32xf32>
    %241 = tpu.matmul %238, %240, %cst_67 {dimension_numbers = #tpu.dot_dimension_numbers<[1], [0], [0], [1], [0, 0, 1, 1], [], []>} : vector<16x32xbf16>, vector<32x32xbf16>, vector<16x32xf32> -> vector<16x32xf32>
    %242 = arith.addf %149, %241 : vector<16x32xf32>
    %243 = vector.extract_strided_slice %155 {offsets = [1, 0], sizes = [1, 32], strides = [1, 1]} : vector<4x128xf32> to vector<1x32xf32>
    %244 = vector.broadcast %243 : vector<1x32xf32> to vector<16x32xf32>
    %245 = arith.addf %242, %244 : vector<16x32xf32>
    %246 = vector.extract_strided_slice %153 {offsets = [0, 0], sizes = [1, 32], strides = [1, 1]} : vector<2x32xf32> to vector<1x32xf32>
    %247 = vector.extract_strided_slice %153 {offsets = [1, 0], sizes = [1, 32], strides = [1, 1]} : vector<2x32xf32> to vector<1x32xf32>
    %cst_68 = arith.constant dense<0.000000e+00> : vector<16xf32>
    %248 = vector.multi_reduction <add>, %245, %cst_68 [1] : vector<16x32xf32> to vector<16xf32>
    %249 = vector.shape_cast %248 : vector<16xf32> to vector<16x1xf32>
    %cst_69 = arith.constant 3.200000e+01 : f32
    %250 = vector.broadcast %cst_69 : f32 to vector<16x1xf32>
    %251 = arith.divf %249, %250 : vector<16x1xf32>
    %252 = vector.broadcast %251 : vector<16x1xf32> to vector<16x32xf32>
    %253 = arith.subf %245, %252 : vector<16x32xf32>
    %254 = arith.mulf %253, %253 : vector<16x32xf32>
    %cst_70 = arith.constant dense<0.000000e+00> : vector<16xf32>
    %255 = vector.multi_reduction <add>, %254, %cst_70 [1] : vector<16x32xf32> to vector<16xf32>
    %256 = vector.shape_cast %255 : vector<16xf32> to vector<16x1xf32>
    %cst_71 = arith.constant 3.200000e+01 : f32
    %257 = vector.broadcast %cst_71 : f32 to vector<16x1xf32>
    %258 = arith.divf %256, %257 : vector<16x1xf32>
    %259 = vector.broadcast %251 : vector<16x1xf32> to vector<16x32xf32>
    %260 = arith.subf %245, %259 : vector<16x32xf32>
    %cst_72 = arith.constant 9.99999974E-6 : f32
    %261 = vector.broadcast %cst_72 : f32 to vector<16x1xf32>
    %262 = arith.addf %258, %261 : vector<16x1xf32>
    %263 = math.rsqrt %262 : vector<16x1xf32>
    %264 = vector.broadcast %263 : vector<16x1xf32> to vector<16x32xf32>
    %265 = arith.mulf %260, %264 : vector<16x32xf32>
    %266 = vector.broadcast %246 : vector<1x32xf32> to vector<16x32xf32>
    %267 = arith.mulf %265, %266 : vector<16x32xf32>
    %268 = vector.broadcast %247 : vector<1x32xf32> to vector<16x32xf32>
    %269 = arith.addf %267, %268 : vector<16x32xf32>
    %270 = arith.truncf %269 : vector<16x32xf32> to vector<16x32xbf16>
    %c1_73 = arith.constant 1 : index
    %c0_74 = arith.constant 0 : index
    %c0_75 = arith.constant 0 : index
    %271 = vector.load %arg6[%c1_73, %c0_74, %c0_75] : memref<2x32x128xbf16, #tpu.memory_space<vmem>>, vector<1x32x128xbf16>
    %272 = vector.shape_cast %271 : vector<1x32x128xbf16> to vector<32x128xbf16>
    %cst_76 = arith.constant dense<0.000000e+00> : vector<16x128xf32>
    %273 = tpu.matmul %270, %272, %cst_76 {dimension_numbers = #tpu.dot_dimension_numbers<[1], [0], [0], [1], [0, 0, 1, 1], [], []>} : vector<16x32xbf16>, vector<32x128xbf16>, vector<16x128xf32> -> vector<16x128xf32>
    %274 = vector.extract_strided_slice %155 {offsets = [2, 0], sizes = [1, 128], strides = [1, 1]} : vector<4x128xf32> to vector<1x128xf32>
    %275 = vector.broadcast %274 : vector<1x128xf32> to vector<16x128xf32>
    %276 = arith.addf %273, %275 : vector<16x128xf32>
    %cst_77 = arith.constant 5.000000e-01 : f32
    %277 = vector.broadcast %cst_77 : f32 to vector<16x128xf32>
    %278 = arith.mulf %277, %276 : vector<16x128xf32>
    %cst_78 = arith.constant 4.471500e-02 : f32
    %279 = vector.broadcast %cst_78 : f32 to vector<16x128xf32>
    %280 = arith.mulf %279, %276 : vector<16x128xf32>
    %281 = arith.mulf %280, %276 : vector<16x128xf32>
    %282 = arith.mulf %281, %276 : vector<16x128xf32>
    %283 = arith.addf %276, %282 : vector<16x128xf32>
    %cst_79 = arith.constant 0.797884583 : f32
    %284 = vector.broadcast %cst_79 : f32 to vector<16x128xf32>
    %285 = arith.mulf %284, %283 : vector<16x128xf32>
    %286 = math.tanh %285 : vector<16x128xf32>
    %cst_80 = arith.constant 1.000000e+00 : f32
    %287 = vector.broadcast %cst_80 : f32 to vector<16x128xf32>
    %288 = arith.addf %287, %286 : vector<16x128xf32>
    %289 = arith.mulf %278, %288 : vector<16x128xf32>
    %290 = arith.truncf %289 : vector<16x128xf32> to vector<16x128xbf16>
    %c1_81 = arith.constant 1 : index
    %c0_82 = arith.constant 0 : index
    %c0_83 = arith.constant 0 : index
    %291 = vector.load %arg7[%c1_81, %c0_82, %c0_83] : memref<2x128x32xbf16, #tpu.memory_space<vmem>>, vector<1x128x32xbf16>
    %292 = vector.shape_cast %291 : vector<1x128x32xbf16> to vector<128x32xbf16>
    %cst_84 = arith.constant dense<0.000000e+00> : vector<16x32xf32>
    %293 = tpu.matmul %290, %292, %cst_84 {dimension_numbers = #tpu.dot_dimension_numbers<[1], [0], [0], [1], [0, 0, 1, 1], [], []>} : vector<16x128xbf16>, vector<128x32xbf16>, vector<16x32xf32> -> vector<16x32xf32>
    %294 = vector.extract_strided_slice %155 {offsets = [3, 0], sizes = [1, 32], strides = [1, 1]} : vector<4x128xf32> to vector<1x32xf32>
    %295 = vector.broadcast %294 : vector<1x32xf32> to vector<16x32xf32>
    %296 = arith.addf %293, %295 : vector<16x32xf32>
    %297 = arith.addf %245, %296 : vector<16x32xf32>
    %c4 = arith.constant 4 : index
    %c0_85 = arith.constant 0 : index
    %c0_86 = arith.constant 0 : index
    %298 = vector.load %arg2[%c4, %c0_85, %c0_86] : memref<5x2x32xf32, #tpu.memory_space<vmem>>, vector<1x2x32xf32>
    %299 = vector.shape_cast %298 : vector<1x2x32xf32> to vector<2x32xf32>
    %300 = vector.extract_strided_slice %299 {offsets = [0, 0], sizes = [1, 32], strides = [1, 1]} : vector<2x32xf32> to vector<1x32xf32>
    %301 = vector.extract_strided_slice %299 {offsets = [1, 0], sizes = [1, 32], strides = [1, 1]} : vector<2x32xf32> to vector<1x32xf32>
    %cst_87 = arith.constant dense<0.000000e+00> : vector<16xf32>
    %302 = vector.multi_reduction <add>, %297, %cst_87 [1] : vector<16x32xf32> to vector<16xf32>
    %303 = vector.shape_cast %302 : vector<16xf32> to vector<16x1xf32>
    %cst_88 = arith.constant 3.200000e+01 : f32
    %304 = vector.broadcast %cst_88 : f32 to vector<16x1xf32>
    %305 = arith.divf %303, %304 : vector<16x1xf32>
    %306 = vector.broadcast %305 : vector<16x1xf32> to vector<16x32xf32>
    %307 = arith.subf %297, %306 : vector<16x32xf32>
    %308 = arith.mulf %307, %307 : vector<16x32xf32>
    %cst_89 = arith.constant dense<0.000000e+00> : vector<16xf32>
    %309 = vector.multi_reduction <add>, %308, %cst_89 [1] : vector<16x32xf32> to vector<16xf32>
    %310 = vector.shape_cast %309 : vector<16xf32> to vector<16x1xf32>
    %cst_90 = arith.constant 3.200000e+01 : f32
    %311 = vector.broadcast %cst_90 : f32 to vector<16x1xf32>
    %312 = arith.divf %310, %311 : vector<16x1xf32>
    %313 = vector.broadcast %305 : vector<16x1xf32> to vector<16x32xf32>
    %314 = arith.subf %297, %313 : vector<16x32xf32>
    %cst_91 = arith.constant 9.99999974E-6 : f32
    %315 = vector.broadcast %cst_91 : f32 to vector<16x1xf32>
    %316 = arith.addf %312, %315 : vector<16x1xf32>
    %317 = math.rsqrt %316 : vector<16x1xf32>
    %318 = vector.broadcast %317 : vector<16x1xf32> to vector<16x32xf32>
    %319 = arith.mulf %314, %318 : vector<16x32xf32>
    %320 = vector.broadcast %300 : vector<1x32xf32> to vector<16x32xf32>
    %321 = arith.mulf %319, %320 : vector<16x32xf32>
    %322 = vector.broadcast %301 : vector<1x32xf32> to vector<16x32xf32>
    %323 = arith.addf %321, %322 : vector<16x32xf32>
    %324 = arith.truncf %323 : vector<16x32xf32> to vector<16x32xbf16>
    %c0_92 = arith.constant 0 : index
    %c0_93 = arith.constant 0 : index
    %325 = vector.load %arg8[%c0_92, %c0_93] : memref<128x32xbf16, #tpu.memory_space<vmem>>, vector<128x32xbf16>
    %cst_94 = arith.constant dense<0.000000e+00> : vector<16x128xf32>
    %326 = tpu.matmul %324, %325, %cst_94 {dimension_numbers = #tpu.dot_dimension_numbers<[1], [1], [0], [0], [0, 0, 1, 0], [], []>} : vector<16x32xbf16>, vector<128x32xbf16>, vector<16x128xf32> -> vector<16x128xf32>
    %c0_95 = arith.constant 0 : index
    %c0_96 = arith.constant 0 : index
    %327 = vector.load %arg9[%c0_95, %c0_96] : memref<16x128xf32, #tpu.memory_space<vmem>>, vector<16x128xf32>
    tpu.vector_store %arg9[%c0_95, %c0_96], %326 {strides = array<i32>} : memref<16x128xf32, #tpu.memory_space<vmem>>, vector<16x128xf32>,
    return
  }
}

</mosaic_0001>

<bundles_post_ra>
// kernel: gpt_lm_forward.1
= control target key start
LH: loop header
LB: loop body
LE: loop exit
PB: predicated region body
PF: predicated region fallthrough
CT: control target
= control target key end

     0   :  { %vm42_vm0 = vcmask 261120   ;;  %s4033_s0 = inlined_call_operand.vmem [shape: f32[16,32], index: 0, kind: input, shape index: {}]   ;;  %s4034_s1 = inlined_call_operand.vmem [shape: f32[16,16], index: 1, kind: input, shape index: {}]   ;;  %s4035_s2 = inlined_call_operand.vmem [shape: f32[5,2,32], index: 2, kind: input, shape index: {}]   ;;  %s4036_s3 = inlined_call_operand.vmem [shape: f32[2,4,128], index: 3, kind: input, shape index: {}]   ;;  %s4037_s4 = inlined_call_operand.vmem [shape: bf16[2,32,96], index: 4, kind: input, shape index: {}]   ;;  %s4038_s5 = inlined_call_operand.vmem [shape: bf16[2,32,32], index: 5, kind: input, shape index: {}]   ;;  %s4039_s6 = inlined_call_operand.vmem [shape: bf16[2,32,128], index: 6, kind: input, shape index: {}]   ;;  %s4040_s7 = inlined_call_operand.vmem [shape: bf16[2,128,32], index: 7, kind: input, shape index: {}]   ;;  %s4041_s8 = inlined_call_operand.vmem [shape: bf16[128,32], index: 8, kind: input, shape index: {}]   ;;  %s4042_s9 = inlined_call_operand.hbm [shape: f32[16,128], index: 9, kind: output, shape index: {}]  }
   0x1   :  { %v3416_v0 = vld [vmem:[%s4033_s0] sm:$0xff]  ;;  %v3421_v1 = vld [vmem:[%s4033_s0 + $0x8] sm:$0xff] }
   0x2   :  { %v43_v2 = vsel %vm42_vm0, %v3416_v0, 0.0  ;;  %v46_v3 = vsel %vm42_vm0, %v3421_v1, 0.0 }
   0x3   :  { %44 = vadd.xlane.f32.xlu0 %v43_v2 }
   0x7   :  { %47 = vadd.xlane.f32.xlu0 %v46_v3 }
   0x8   :  { %14 = vsyncpa [#allocation3], 0  ;;  %v3201_v14 = vld [vmem:[%s4037_s4 + $0x8] sm:$0xff]   ;;  %v3351_v15 = vmov 0.0   ;;  %vm3352_vm1 = vmmov 0   ;;  %v3202_v16 = vld [vmem:[%s4037_s4] sm:$0xff]   ;;  %v70_v23 = vlaneseq }
   0x9   :  { %2939 = vmatprep.subr.bf16.mxu0 %v3351_v15  ;;  %2943 = vmatprep.mubr.msk.bf16.mxu0 %vm3352_vm1, %v3351_v15  ;;  %v38_v26 = vld [vmem:[%s4035_s2] sm:$0x3]  ;;  %vm165_vm2 = vcmask 64512   ;;  %s3353_s20 = smov 120   ;;  %s3354_s21 = smov 112   ;;  %v3541_v61 = vld [vmem:[%s4034_s1 + $0x8] sm:$0xff] }
   0xa   :  { %2940 = vmatpush3.bf16.msra.mxu0 %v3201_v14  ;;  %v3441_v24 = vshrl.u32 %v70_v23, 7  ;;  %v3458_v39 = vld [vmem:[%s4036_s3] sm:$0xf]  ;;  %s3355_s22 = smov 104   ;;  %s3356_s23 = smov 96   ;;  %vm510_vm3 = vcmask 130048  }
   0xb   :  { %2941 = vmatprep.subr.bf16.mxu0 %v3351_v15  ;;  %v3546_v63 = vld [vmem:[%s4034_s1] sm:$0xff]  ;;  %s3357_s1 = smov 64   ;;  %s3358_s30 = smov 8   ;;  %vm975_vm4 = vcmask 195584  }
   0xc   :  { %v3444_v25 = vsub.s32 0, %v3441_v24  ;;  %v3451_v30 = vsub.s32 1, %v3441_v24  ;;  %s3359_s12 = smov 16   ;;  %s3360_s0 = smov 24  }
   0xe   :  { %2942 = vmatpush3.bf16.msra.mxu0 %v3202_v16  ;;  %v73_v29 = vrot.slane %v38_v26, %v3444_v25  ;;  %v79_v34 = vrot.slane %v38_v26, %v3451_v30  ;;  %v90_v40 = vrot.slane %v3458_v39, %v3444_v25 }
  0x8c   :  { %v45_v4 = vpop.xlane.xlu0 %44 }
  0x8d   :  { %v50_v5 = vmul.f32 0.03125, %v45_v4 }
  0x8f   :  { %v52_v6 = vsub.f32 %v3416_v0, %v50_v5 }
  0x90   :  { %v48_v7 = vpop.xlane.xlu0 %47 }
  0x91   :  { %v51_v8 = vmul.f32 0.03125, %v48_v7  ;;  %v54_v9 = vmul.f32 %v52_v6, %v52_v6 }
  0x93   :  { %v53_v10 = vsub.f32 %v3421_v1, %v51_v8  ;;  %v56_v11 = vsel %vm42_vm0, %v54_v9, 0.0 }
  0x94   :  { %57 = vadd.xlane.f32.xlu1 %v56_v11 }
  0x95   :  { %v55_v12 = vmul.f32 %v53_v10, %v53_v10 }
  0x97   :  { %v59_v13 = vsel %vm42_vm0, %v55_v12, 0.0 }
  0x98   :  { %60 = vadd.xlane.f32.xlu1 %v59_v13 }
 0x11d   :  { %v58_v17 = vpop.xlane.xlu1 %57 }
 0x11e   :  { %v62_v18 = vmul.f32 0.03125, %v58_v17 }
 0x120   :  { %v64_v19 = vadd.f32 1e-05, %v62_v18 }
 0x121   :  { %v61_v20 = vpop.xlane.xlu1 %60 }
 0x122   :  { %3237 = vrsqrt.f32 %v64_v19  ;;  %v63_v21 = vmul.f32 0.03125, %v61_v20 }
 0x124   :  { %v65_v22 = vadd.f32 1e-05, %v63_v21 }
 0x126   :  { %3239 = vrsqrt.f32 %v65_v22 }
 0x12f   :  { %v3238_v27 = vpop.eup %3237 }
 0x130   :  { %v68_v28 = vmul.f32 %v3238_v27, %v52_v6 }
 0x132   :  { %v74_v33 = vmul.f32 %v73_v29, %v68_v28 }
 0x133   :  { %v3240_v31 = vpop.eup %3239 }
 0x134   :  { %v69_v32 = vmul.f32 %v3240_v31, %v53_v10  ;;  %v80_v36 = vadd.f32 %v79_v34, %v74_v33 }
 0x136   :  { %v75_v35 = vmul.f32 %v73_v29, %v69_v32 }
 0x138   :  { %v81_v37 = vadd.f32 %v79_v34, %v75_v35 }
 0x13a   :  { %v82_v38 = vpack.c.bf16 %v81_v37, %v80_v36 }
 0x13c   :  { %2944 = vmatmul.mubr.msk.bf16.vlgmr.msra.gmra.mxu0 %vm42_vm0, %v82_v38 }
 0x1fc   :  { %v140_v41 = vpop.f32.mrf.mxu0 }
 0x1fd   :  { %v3462_v42 = vadd.f32 %v140_v41, %v90_v40 }
 0x1fe   :  { %v2945_v43 = vpop.f32.mrf.mxu0 }
 0x1ff   :  { %149 = vrot.lane.b32.xlu1 %v3462_v42, %s3353_s20  ;;  %2951 = vmatprep.mubr.msk.f32.mxu0 %vm165_vm2, %v3462_v42 }
 0x200   :  { %v143_v44 = vpop.f32.mrf.mxu0 }
 0x201   :  { %v3468_v45 = vadd.f32 %v143_v44, %v90_v40 }
 0x202   :  { %v2946_v46 = vpop.f32.mrf.mxu0 }
 0x203   :  { %155 = vrot.lane.b32.xlu1 %v3468_v45, %s3354_s21  ;;  %151 = vrot.lane.b32.xlu0 %v3468_v45, %s3353_s20 }
 0x207   :  { %153 = vrot.lane.b32.xlu1 %v3462_v42, %s3354_s21  ;;  %159 = vrot.lane.b32.xlu0 %v3468_v45, %s3355_s22 }
 0x20b   :  { %157 = vrot.lane.b32.xlu1 %v3462_v42, %s3355_s22  ;;  %163 = vrot.lane.b32.xlu0 %v3468_v45, %s3356_s23 }
 0x20f   :  { %161 = vrot.lane.b32.xlu1 %v3462_v42, %s3356_s23 }
 0x271   :  { %v3484_v47 = vpop.permute.xlu1 %149 }
 0x272   :  { %249 = vrot.lane.b32.xlu1 %v3484_v47, %s3356_s23 }
 0x275   :  { %v3488_v48 = vpop.permute.xlu1 %155  ;;  %v3490_v49 = vpop.permute.xlu0 %151 }
 0x276   :  { %251 = vrot.lane.b32.xlu0 %v3490_v49, %s3356_s23 }
 0x279   :  { %v3494_v50 = vpop.permute.xlu1 %153  ;;  %v3496_v51 = vpop.permute.xlu0 %159 }
 0x27a   :  { %336 = vrot.lane.b32.xlu1 %v3494_v50, %s3356_s23  ;;  %338 = vrot.lane.b32.xlu0 %v3488_v48, %s3356_s23 }
 0x27d   :  { %v3502_v52 = vpop.permute.xlu1 %157  ;;  %v164_v53 = vpop.permute.xlu0 %163 }
 0x27e   :  { %423 = vrot.lane.b32.xlu1 %v3502_v52, %s3356_s23  ;;  %425 = vrot.lane.b32.xlu0 %v3496_v51, %s3356_s23 }
 0x27f   :  { %2947 = vmatprep.subr.msk.mxu0 %vm165_vm2, %v164_v53 }
 0x280   :  { %2948 = vmatpush3.xpose.msk.msra.mxu0 %vm165_vm2, %v164_v53 }
 0x281   :  { %v162_v54 = vpop.permute.xlu1 %161 }
 0x282   :  { %2949 = vmatprep.subr.msk.mxu0 %vm165_vm2, %v162_v54 }
 0x284   :  { %2950 = vmatpush3.xpose.msk.msra.mxu0 %vm165_vm2, %v162_v54 }
 0x287   :  { %2952 = vmatmul.mubr.msk.f32.vlgmr.msra.gmra.mxu0 %vm165_vm2, %v3468_v45 }
 0x288   :  { %2958 = vmatprep.mubr.msk.f32.mxu0 %vm165_vm2, %v3484_v47 }
 0x2e4   :  { %v250_v56 = vpop.permute.xlu1 %249 }
 0x2e8   :  { %v252_v55 = vpop.permute.xlu0 %251 }
 0x2e9   :  { %2954 = vmatprep.subr.msk.mxu0 %vm165_vm2, %v252_v55 }
 0x2ea   :  { %2955 = vmatpush3.xpose.msk.msra.mxu0 %vm165_vm2, %v252_v55 }
 0x2eb   :  { %2956 = vmatprep.subr.msk.mxu0 %vm165_vm2, %v250_v56 }
 0x2ec   :  { %v339_v57 = vpop.permute.xlu0 %338  ;;  %v337_v58 = vpop.permute.xlu1 %336 }
 0x2ee   :  { %2957 = vmatpush3.xpose.msk.msra.mxu0 %vm165_vm2, %v250_v56 }
 0x2ef   :  { %2961 = vmatprep.subr.msk.mxu0 %vm165_vm2, %v339_v57 }
 0x2f0   :  { %v426_v59 = vpop.permute.xlu0 %425  ;;  %v424_v60 = vpop.permute.xlu1 %423 }
 0x2f1   :  { %2959 = vmatmul.mubr.msk.f32.vlgmr.msra.gmra.mxu0 %vm165_vm2, %v3490_v49 }
 0x2f2   :  { %2962 = vmatpush3.xpose.msk.msra.mxu0 %vm165_vm2, %v339_v57  ;;  %2965 = vmatprep.mubr.msk.f32.mxu0 %vm165_vm2, %v3494_v50 }
 0x2f3   :  { %2963 = vmatprep.subr.msk.mxu0 %vm165_vm2, %v337_v58 }
 0x2f6   :  { %2964 = vmatpush3.xpose.msk.msra.mxu0 %vm165_vm2, %v337_v58 }
 0x2f7   :  { %2968 = vmatprep.subr.msk.mxu0 %vm165_vm2, %v426_v59 }
 0x2f9   :  { %2966 = vmatmul.mubr.msk.f32.vlgmr.msra.gmra.mxu0 %vm165_vm2, %v3488_v48 }
 0x2fa   :  { %2969 = vmatpush3.xpose.msk.msra.mxu0 %vm165_vm2, %v426_v59  ;;  %2972 = vmatprep.mubr.msk.f32.mxu0 %vm165_vm2, %v3502_v52 }
 0x2fb   :  { %2970 = vmatprep.subr.msk.mxu0 %vm165_vm2, %v424_v60 }
 0x2fe   :  { %2971 = vmatpush3.xpose.msk.msra.mxu0 %vm165_vm2, %v424_v60 }
 0x301   :  { %2973 = vmatmul.mubr.msk.f32.vlgmr.msra.gmra.mxu0 %vm165_vm2, %v3496_v51 }
 0x347   :  { %v2953_v62 = vpop.f32.mrf.mxu0 }
 0x348   :  { %v246_v2 = vadd.f32 %v2953_v62, %v3541_v61 }
 0x349   :  { %v240_v3 = vpop.f32.mrf.mxu0 }
 0x34a   :  { %v241_v4 = vadd.f32 %v240_v3, %v3546_v63  ;;  %v514_v5 = vsel %vm510_vm3, %v246_v2, -inf }
 0x34b   :  { %515 = vmax.xlane.f32.xlu1 %v514_v5 }
 0x34c   :  { %v511_v6 = vsel %vm510_vm3, %v241_v4, -inf }
 0x34d   :  { %512 = vmax.xlane.f32.xlu0 %v511_v6 }
 0x3b1   :  { %v2960_v7 = vpop.f32.mrf.mxu0 }
 0x3b2   :  { %v333_v8 = vadd.f32 %v2960_v7, %v3541_v61 }
 0x3b3   :  { %v327_v9 = vpop.f32.mrf.mxu0 }
 0x3b4   :  { %v328_v10 = vadd.f32 %v327_v9, %v3546_v63  ;;  %v520_v11 = vsel %vm510_vm3, %v333_v8, -inf }
 0x3b5   :  { %521 = vmax.xlane.f32.xlu0 %v520_v11 }
 0x3b6   :  { %v517_v12 = vsel %vm510_vm3, %v328_v10, -inf }
 0x3b9   :  { %v2967_v13 = vpop.f32.mrf.mxu0  ;;  %518 = vmax.xlane.f32.xlu0 %v517_v12 }
 0x3ba   :  { %v420_v14 = vadd.f32 %v2967_v13, %v3541_v61 }
 0x3bb   :  { %v414_v16 = vpop.f32.mrf.mxu0 }
 0x3bc   :  { %v415_v17 = vadd.f32 %v414_v16, %v3546_v63  ;;  %v526_v18 = vsel %vm510_vm3, %v420_v14, -inf }
 0x3bd   :  { %527 = vmax.xlane.f32.xlu1 %v526_v18 }
 0x3be   :  { %v523_v19 = vsel %vm510_vm3, %v415_v17, -inf }
 0x3bf   :  { %524 = vmax.xlane.f32.xlu0 %v523_v19 }
 0x3c1   :  { %v2974_v20 = vpop.f32.mrf.mxu0 }
 0x3c2   :  { %v507_v21 = vadd.f32 %v2974_v20, %v3541_v61 }
 0x3c3   :  { %v501_v22 = vpop.f32.mrf.mxu0 }
 0x3c4   :  { %v502_v23 = vadd.f32 %v501_v22, %v3546_v63  ;;  %v532_v26 = vsel %vm510_vm3, %v507_v21, -inf }
 0x3c5   :  { %533 = vmax.xlane.f32.xlu1 %v532_v26 }
 0x3c6   :  { %v529_v27 = vsel %vm510_vm3, %v502_v23, -inf }
 0x3c7   :  { %530 = vmax.xlane.f32.xlu0 %v529_v27 }
 0x3d4   :  { %v516_v31 = vpop.xlane.xlu1 %515 }
 0x3d5   :  { %v536_v33 = vsub.f32 %v246_v2, %v516_v31 }
 0x3d6   :  { %599 = vrot.lane.b32.xlu1 %v3462_v42, %s3357_s1  ;;  %v513_v28 = vpop.xlane.xlu0 %512 }
 0x3d7   :  { %v535_v29 = vsub.f32 %v241_v4, %v513_v28  ;;  %v545_v34 = vmul.f32 1.442695, %v536_v33 }
 0x3d9   :  { %v543_v32 = vmul.f32 1.442695, %v535_v29 }
 0x3da   :  { %688 = vrot.lane.b32.xlu1 %v3490_v49, %s3357_s1 }
 0x3db   :  { %3241 = vpow2.f32 %v543_v32 }
 0x3dc   :  { %3243 = vpow2.f32 %v545_v34 }
 0x3dd   :  { %601 = vrot.lane.b32.xlu0 %v3468_v45, %s3357_s1 }
 0x3de   :  { %686 = vrot.lane.b32.xlu1 %v3484_v47, %s3357_s1 }
 0x3e1   :  { %775 = vrot.lane.b32.xlu0 %v3488_v48, %s3357_s1 }
 0x3e2   :  { %862 = vrot.lane.b32.xlu1 %v3496_v51, %s3357_s1 }
 0x3e8   :  { %v3576_v35 = vpop.eup %3241 }
 0x3e9   :  { %v559_v36 = vsel %vm510_vm3, %v3576_v35, 0.0  ;;  %v3580_v37 = vpop.eup %3243 }
 0x3ea   :  { %v562_v38 = vsel %vm510_vm3, %v3580_v37, 0.0 }
 0x400   :  { %560 = vadd.xlane.f32.xlu0 %v559_v36 }
 0x406   :  { %563 = vadd.xlane.f32.xlu1 %v562_v38 }
 0x43e   :  { %v522_v40 = vpop.xlane.xlu0 %521 }
 0x43f   :  { %v538_v41 = vsub.f32 %v333_v8, %v522_v40 }
 0x441   :  { %v549_v42 = vmul.f32 1.442695, %v538_v41 }
 0x442   :  { %v519_v43 = vpop.xlane.xlu0 %518 }
 0x443   :  { %3245 = vpow2.f32 %v549_v42  ;;  %v537_v44 = vsub.f32 %v328_v10, %v519_v43 }
 0x445   :  { %v547_v45 = vmul.f32 1.442695, %v537_v44 }
 0x446   :  { %v528_v46 = vpop.xlane.xlu1 %527 }
 0x447   :  { %3247 = vpow2.f32 %v547_v45  ;;  %v540_v47 = vsub.f32 %v420_v14, %v528_v46 }
 0x448   :  { %v525_v48 = vpop.xlane.xlu0 %524 }
 0x449   :  { %v553_v49 = vmul.f32 1.442695, %v540_v47  ;;  %v539_v51 = vsub.f32 %v415_v17, %v525_v48 }
 0x44b   :  { %3249 = vpow2.f32 %v553_v49  ;;  %v551_v53 = vmul.f32 1.442695, %v539_v51  ;;  %v3203_v51 = vld [vmem:[%s4038_s5 + $0x8] sm:$0xff]  }
 0x44d   :  { %3251 = vpow2.f32 %v551_v53 }
 0x44e   :  { %v534_v54 = vpop.xlane.xlu1 %533 }
 0x44f   :  { %v542_v55 = vsub.f32 %v507_v21, %v534_v54 }
 0x450   :  { %v3584_v56 = vpop.eup %3245  ;;  %v531_v57 = vpop.xlane.xlu0 %530 }
 0x451   :  { %v557_v58 = vmul.f32 1.442695, %v542_v55  ;;  %v541_v59 = vsub.f32 %v502_v23, %v531_v57  ;;  %v568_v60 = vsel %vm510_vm3, %v3584_v56, 0.0 }
 0x452   :  { %v600_v62 = vpop.permute.xlu1 %599  ;;  %569 = vadd.xlane.f32.xlu1 %v568_v60 }
 0x453   :  { %3253 = vpow2.f32 %v557_v58  ;;  %v555_v2 = vmul.f32 1.442695, %v541_v59 }
 0x454   :  { %v3248_v3 = vpop.eup %3247  ;;  %v602_v4 = vpop.permute.xlu0 %601 }
 0x455   :  { %3255 = vpow2.f32 %v555_v2  ;;  %2975 = vmatprep.subr.mxu1 %v602_v4  ;;  %v565_v5 = vsel %vm510_vm3, %v3248_v3, 0.0 }
 0x456   :  { %566 = vadd.xlane.f32.xlu0 %v565_v5  ;;  %2976 = vmatpush3.msra.mxu1 %v602_v4  ;;  %v689_v7 = vpop.permute.xlu1 %688 }
 0x457   :  { %2977 = vmatprep.subr.mxu1 %v600_v62 }
 0x458   :  { %v3589_v6 = vpop.eup %3249  ;;  %2978 = vmatpush3.msra.mxu1 %v600_v62  ;;  %v776_v8 = vpop.permute.xlu0 %775 }
 0x459   :  { %2982 = vmatprep.subr.mxu1 %v689_v7  ;;  %2989 = vmatprep.subr.mxu0 %v776_v8  ;;  %v574_v9 = vsel %vm510_vm3, %v3589_v6, 0.0 }
 0x45a   :  { %v3252_v10 = vpop.eup %3251  ;;  %575 = vadd.xlane.f32.xlu1 %v574_v9  ;;  %2990 = vmatpush3.msra.mxu0 %v776_v8  ;;  %v687_v17 = vpop.permute.xlu1 %686 }
 0x45b   :  { %v571_v11 = vsel %vm510_vm3, %v3252_v10, 0.0 }
 0x45c   :  { %572 = vadd.xlane.f32.xlu0 %v571_v11 }
 0x45e   :  { %v863_v19 = vpop.permute.xlu1 %862 }
 0x460   :  { %v3254_v12 = vpop.eup %3253 }
 0x461   :  { %v580_v13 = vsel %vm510_vm3, %v3254_v12, 0.0 }
 0x462   :  { %v3256_v14 = vpop.eup %3255  ;;  %581 = vadd.xlane.f32.xlu1 %v580_v13 }
 0x463   :  { %v577_v16 = vsel %vm510_vm3, %v3256_v14, 0.0 }
 0x464   :  { %578 = vadd.xlane.f32.xlu0 %v577_v16 }
 0x473   :  { %860 = vrot.lane.b32.xlu1 %v3502_v52, %s3357_s1 }
 0x47a   :  { %773 = vrot.lane.b32.xlu0 %v3494_v50, %s3357_s1 }
 0x489   :  { %v561_v18 = vpop.xlane.xlu0 %560 }
 0x48a   :  { %3257 = vrcp.f32 %v561_v18 }
 0x48f   :  { %v564_v20 = vpop.xlane.xlu1 %563 }
 0x490   :  { %3259 = vrcp.f32 %v564_v20 }
 0x497   :  { %v3258_v21 = vpop.eup %3257 }
 0x498   :  { %v591_v22 = vmul.f32 %v3258_v21, %v3576_v35 }
 0x49a   :  { %2979 = vmatprep.mubr.msk.f32.mxu1 %vm510_vm3, %v591_v22 }
 0x49d   :  { %v3260_v23 = vpop.eup %3259 }
 0x49e   :  { %v592_v26 = vmul.f32 %v3260_v23, %v3580_v37 }
 0x4a0   :  { %2980 = vmatmul.mubr.msk.f32.vlgmr.msra.gmra.mxu1 %vm510_vm3, %v592_v26 }
 0x4a1   :  { %2983 = vmatpush3.msra.mxu1 %v689_v7 }
 0x4a2   :  { %2984 = vmatprep.subr.mxu1 %v687_v17 }
 0x4a3   :  { %2985 = vmatpush3.msra.mxu1 %v687_v17 }
 0x4a4   :  { %2996 = vmatprep.subr.mxu1 %v863_v19 }
 0x4db   :  { %v570_v50 = vpop.xlane.xlu1 %569 }
 0x4dc   :  { %3261 = vrcp.f32 %v570_v50 }
 0x4df   :  { %v567_v52 = vpop.xlane.xlu0 %566 }
 0x4e0   :  { %3263 = vrcp.f32 %v567_v52 }
 0x4e3   :  { %v576_v27 = vpop.xlane.xlu1 %575 }
 0x4e4   :  { %3265 = vrcp.f32 %v576_v27 }
 0x4e5   :  { %v573_v28 = vpop.xlane.xlu0 %572 }
 0x4e6   :  { %3267 = vrcp.f32 %v573_v28 }
 0x4e9   :  { %v3262_v31 = vpop.eup %3261 }
 0x4ea   :  { %v594_v35 = vmul.f32 %v3262_v31, %v3584_v56  ;;  %v3204_v56 = vld [vmem:[%s4038_s5] sm:$0xff]  }
 0x4eb   :  { %v582_v29 = vpop.xlane.xlu1 %581 }
 0x4ec   :  { %3269 = vrcp.f32 %v582_v29 }
 0x4ed   :  { %v3264_v32 = vpop.eup %3263  ;;  %v579_v33 = vpop.xlane.xlu0 %578 }
 0x4ee   :  { %3271 = vrcp.f32 %v579_v33  ;;  %v593_v34 = vmul.f32 %v3264_v32, %v3248_v3 }
 0x4ef   :  { %v861_v38 = vpop.permute.xlu1 %860 }
 0x4f0   :  { %2986 = vmatprep.mubr.msk.f32.mxu1 %vm510_vm3, %v593_v34 }
 0x4f1   :  { %2987 = vmatmul.mubr.msk.f32.vlgmr.msra.gmra.mxu1 %vm510_vm3, %v594_v35  ;;  %v774_v36 = vpop.permute.xlu0 %773  ;;  %v3266_v37 = vpop.eup %3265 }
 0x4f2   :  { %2997 = vmatpush3.msra.mxu1 %v863_v19  ;;  %2991 = vmatprep.subr.mxu0 %v774_v36  ;;  %v596_v42 = vmul.f32 %v3266_v37, %v3589_v6  ;;  %v1044_v19 = vrot.slane %v3458_v39, %v3451_v30 }
 0x4f3   :  { %v3268_v40 = vpop.eup %3267  ;;  %2998 = vmatprep.subr.mxu1 %v861_v38  ;;  %2992 = vmatpush3.msra.mxu0 %v774_v36 }
 0x4f4   :  { %2999 = vmatpush3.msra.mxu1 %v861_v38  ;;  %v595_v41 = vmul.f32 %v3268_v40, %v3252_v10  ;;  %3003 = vmatprep.subr.bf16.mxu0 %v3351_v15  ;;  %v3205_v40 = vld [vmem:[%s4039_s6 + $0x8] sm:$0xff]  }
 0x4f5   :  { %3011 = vmatprep.subr.bf16.mxu1 %v3351_v15 }
 0x4f6   :  { %2993 = vmatprep.mubr.msk.f32.mxu0 %vm510_vm3, %v595_v41  ;;  %v3206_v41 = vld [vmem:[%s4039_s6] sm:$0xff]  }
 0x4f7   :  { %2994 = vmatmul.mubr.msk.f32.vlgmr.msra.gmra.mxu0 %vm510_vm3, %v596_v42 }
 0x4f8   :  { %3007 = vmatprep.mubr.msk.bf16.mxu0 %vm3352_vm1, %v3351_v15  ;;  %3004 = vmatpush3.bf16.msra.mxu0 %v3203_v51 }
 0x4f9   :  { %v3270_v43 = vpop.eup %3269  ;;  %3005 = vmatprep.subr.bf16.mxu0 %v3351_v15 }
 0x4fa   :  { %v598_v46 = vmul.f32 %v3270_v43, %v3254_v12 }
 0x4fb   :  { %v3272_v44 = vpop.eup %3271 }
 0x4fc   :  { %v597_v45 = vmul.f32 %v3272_v44, %v3256_v14  ;;  %3006 = vmatpush3.bf16.msra.mxu0 %v3204_v56 }
 0x4fd   :  { %3019 = vmatprep.subr.bf16.mxu0 %v3351_v15 }
 0x4fe   :  { %3000 = vmatprep.mubr.msk.f32.mxu1 %vm510_vm3, %v597_v45 }
 0x4ff   :  { %3001 = vmatmul.mubr.msk.f32.vlgmr.msra.gmra.mxu1 %vm510_vm3, %v598_v46 }
 0x500   :  { %3015 = vmatprep.mubr.msk.bf16.mxu1 %vm3352_vm1, %v3351_v15  ;;  %3012 = vmatpush3.bf16.msra.mxu1 %v3205_v40  ;;  %v1187_v40 = vsub.s32 3, %v3441_v24 }
 0x501   :  { %3013 = vmatprep.subr.bf16.mxu1 %v3351_v15 }
 0x504   :  { %3014 = vmatpush3.bf16.msra.mxu1 %v3206_v41  ;;  %v1188_v41 = vrot.slane %v3458_v39, %v1187_v40 }
 0x505   :  { %3039 = vmatprep.subr.bf16.mxu1 %v3351_v15 }
 0x560   :  { %v2981_v47 = vpop.f32.mrf.mxu1 }
 0x562   :  { %v677_v48 = vpop.f32.mrf.mxu1 }
 0x5b1   :  { %v2988_v49 = vpop.f32.mrf.mxu1 }
 0x5b3   :  { %v764_v53 = vpop.f32.mrf.mxu1 }
 0x5b4   :  { %v3171_v54 = vpack.i.bf16 %v2988_v49, %v764_v53 }
 0x5b6   :  { %3172 = vrot.lane.b32.xlu0 %v3171_v54, %s3358_s30 }
 0x5b7   :  { %v2995_v55 = vpop.f32.mrf.mxu0 }
 0x5b9   :  { %v851_v57 = vpop.f32.mrf.mxu0 }
 0x5ba   :  { %v3176_v58 = vpack.i.bf16 %v2995_v55, %v851_v57 }
 0x5bc   :  { %3177 = vrot.lane.b32.xlu1 %v3176_v58, %s3359_s12 }
 0x5bf   :  { %v3002_v59 = vpop.f32.mrf.mxu1 }
 0x5c1   :  { %v938_v60 = vpop.f32.mrf.mxu1 }
 0x5c2   :  { %v3181_v62 = vpack.i.bf16 %v3002_v59, %v938_v60 }
 0x5c4   :  { %3182 = vrot.lane.b32.xlu0 %v3181_v62, %s3360_s0 }
 0x628   :  { %v3173_v2 = vpop.permute.xlu0 %3172 }
 0x629   :  { %v3175_v4 = vunpack.i.h.bf16 %v3173_v2  ;;  %v3174_v5 = vunpack.i.l.bf16 %v3173_v2  ;;  %v3207_v2 = vld [vmem:[%s4040_s7 + $0x38] sm:$0xff]  }
 0x62b   :  { %v972_v9 = vsel %vm165_vm2, %v2981_v47, %v3175_v4  ;;  %v971_v10 = vsel %vm165_vm2, %v677_v48, %v3174_v5  ;;  %v2706_v48 = vld [vmem:[%s4035_s2 + $0x2] sm:$0x3]  ;;  %v3209_v4 = vld [vmem:[%s4040_s7 + $0x28] sm:$0xff]  }
 0x62c   :  { %v1076_v53 = vrot.slane %v2706_v48, %v3444_v25  ;;  %v1082_v57 = vrot.slane %v2706_v48, %v3451_v30  ;;  %v3210_v5 = vld [vmem:[%s4040_s7 + $0x20] sm:$0xff]  }
 0x62e   :  { %v3178_v3 = vpop.permute.xlu1 %3177 }
 0x62f   :  { %v3180_v6 = vunpack.i.h.bf16 %v3178_v3  ;;  %v3179_v7 = vunpack.i.l.bf16 %v3178_v3  ;;  %v3208_v3 = vld [vmem:[%s4040_s7 + $0x30] sm:$0xff]  }
 0x631   :  { %v973_v13 = vsel %vm510_vm3, %v971_v10, %v3179_v7  ;;  %v974_v14 = vsel %vm510_vm3, %v972_v9, %v3180_v6  ;;  %v3211_v6 = vld [vmem:[%s4040_s7 + $0x18] sm:$0xff]   ;;  %v3212_v7 = vld [vmem:[%s4040_s7 + $0x10] sm:$0xff]   ;;  %v3214_v9 = vld [vmem:[%s4040_s7] sm:$0xff]   ;;  %v1092_v10 = vsub.s32 2, %v3441_v24 }
 0x632   :  { %v3229_v24 = vld [vmem:[%s4041_s8 + $0x38] sm:$0xff]  }
 0x636   :  { %v3183_v8 = vpop.permute.xlu0 %3182 }
 0x637   :  { %v3185_v11 = vunpack.i.h.bf16 %v3183_v8  ;;  %v3184_v12 = vunpack.i.l.bf16 %v3183_v8  ;;  %v3213_v8 = vld [vmem:[%s4040_s7 + $0x8] sm:$0xff]  }
 0x639   :  { %v976_v16 = vsel %vm975_vm4, %v973_v13, %v3184_v12  ;;  %v977_v17 = vsel %vm975_vm4, %v974_v14, %v3185_v11  ;;  %v1093_v11 = vrot.slane %v3458_v39, %v1092_v10 }
 0x63a   :  { %v978_v18 = vpack.c.bf16 %v977_v17, %v976_v16 }
 0x63c   :  { %3008 = vmatmul.mubr.msk.bf16.vlgmr.msra.gmra.mxu0 %vm42_vm0, %v978_v18 }
 0x63d   :  { %3035 = vmatprep.mubr.msk.bf16.mxu0 %vm3352_vm1, %v3351_v15  ;;  %3020 = vmatpush3.bf16.msra.mxu0 %v3207_v2  ;;  %v3216_v2 = vld [vmem:[%s4037_s4 + $0x10] sm:$0xff]  }
 0x63e   :  { %3021 = vmatprep.subr.bf16.mxu0 %v3351_v15 }
 0x641   :  { %3022 = vmatpush3.bf16.msra.mxu0 %v3208_v3 }
 0x642   :  { %3023 = vmatprep.subr.bf16.mxu0 %v3351_v15 }
 0x645   :  { %3024 = vmatpush3.bf16.msra.mxu0 %v3209_v4 }
 0x646   :  { %3025 = vmatprep.subr.bf16.mxu0 %v3351_v15 }
 0x649   :  { %3026 = vmatpush3.bf16.msra.mxu0 %v3210_v5 }
 0x64a   :  { %3027 = vmatprep.subr.bf16.mxu0 %v3351_v15 }
 0x64d   :  { %3028 = vmatpush3.bf16.msra.mxu0 %v3211_v6 }
 0x64e   :  { %3029 = vmatprep.subr.bf16.mxu0 %v3351_v15 }
 0x651   :  { %3030 = vmatpush3.bf16.msra.mxu0 %v3212_v7 }
 0x652   :  { %3031 = vmatprep.subr.bf16.mxu0 %v3351_v15 }
 0x655   :  { %3032 = vmatpush3.bf16.msra.mxu0 %v3213_v8 }
 0x656   :  { %3033 = vmatprep.subr.bf16.mxu0 %v3351_v15 }
 0x659   :  { %3034 = vmatpush3.bf16.msra.mxu0 %v3214_v9  ;;  %v2748_v9 = vld [vmem:[%s4035_s2 + $0x4] sm:$0x3] }
 0x6fc   :  { %v1032_v20 = vpop.f32.mrf.mxu0 }
 0x6fd   :  { %v1039_v21 = vadd.f32 %v1032_v20, %v3416_v0 }
 0x6fe   :  { %v3009_v22 = vpop.f32.mrf.mxu0 }
 0x6ff   :  { %v3641_v23 = vadd.f32 %v1044_v19, %v1039_v21 }
 0x700   :  { %v1035_v26 = vpop.f32.mrf.mxu0 }
 0x701   :  { %v1040_v50 = vadd.f32 %v1035_v26, %v3421_v1  ;;  %v1047_v52 = vsel %vm42_vm0, %v3641_v23, 0.0 }
 0x702   :  { %1048 = vadd.xlane.f32.xlu1 %v1047_v52  ;;  %v3010_v27 = vpop.f32.mrf.mxu0 }
 0x703   :  { %v3646_v28 = vadd.f32 %v1044_v19, %v1040_v50 }
 0x705   :  { %v1050_v29 = vsel %vm42_vm0, %v3646_v28, 0.0 }
 0x706   :  { %1051 = vadd.xlane.f32.xlu0 %v1050_v29 }
 0x78b   :  { %v1049_v31 = vpop.xlane.xlu1 %1048 }
 0x78c   :  { %v1053_v32 = vmul.f32 0.03125, %v1049_v31 }
 0x78e   :  { %v1055_v0 = vsub.f32 %v3641_v23, %v1053_v32 }
 0x78f   :  { %v1052_v33 = vpop.xlane.xlu0 %1051 }
 0x790   :  { %v1054_v34 = vmul.f32 0.03125, %v1052_v33  ;;  %v1057_v35 = vmul.f32 %v1055_v0, %v1055_v0 }
 0x792   :  { %v1056_v1 = vsub.f32 %v3646_v28, %v1054_v34  ;;  %v1059_v36 = vsel %vm42_vm0, %v1057_v35, 0.0 }
 0x793   :  { %1060 = vadd.xlane.f32.xlu0 %v1059_v36 }
 0x794   :  { %v1058_v37 = vmul.f32 %v1056_v1, %v1056_v1 }
 0x796   :  { %v1062_v38 = vsel %vm42_vm0, %v1058_v37, 0.0 }
 0x797   :  { %1063 = vadd.xlane.f32.xlu0 %v1062_v38 }
 0x81c   :  { %v1061_v42 = vpop.xlane.xlu0 %1060 }
 0x81d   :  { %v1065_v43 = vmul.f32 0.03125, %v1061_v42 }
 0x81f   :  { %v1067_v44 = vadd.f32 1e-05, %v1065_v43 }
 0x820   :  { %v1064_v45 = vpop.xlane.xlu0 %1063 }
 0x821   :  { %3273 = vrsqrt.f32 %v1067_v44  ;;  %v1066_v46 = vmul.f32 0.03125, %v1064_v45 }
 0x823   :  { %v1068_v47 = vadd.f32 1e-05, %v1066_v46 }
 0x825   :  { %3275 = vrsqrt.f32 %v1068_v47 }
 0x82e   :  { %v3274_v49 = vpop.eup %3273 }
 0x82f   :  { %v1071_v51 = vmul.f32 %v3274_v49, %v1055_v0 }
 0x831   :  { %v1077_v56 = vmul.f32 %v1076_v53, %v1071_v51 }
 0x832   :  { %v3276_v54 = vpop.eup %3275 }
 0x833   :  { %v1072_v55 = vmul.f32 %v3276_v54, %v1056_v1  ;;  %v1083_v59 = vadd.f32 %v1082_v57, %v1077_v56 }
 0x835   :  { %v1078_v58 = vmul.f32 %v1076_v53, %v1072_v55 }
 0x837   :  { %v1084_v60 = vadd.f32 %v1082_v57, %v1078_v58 }
 0x839   :  { %v1085_v62 = vpack.c.bf16 %v1084_v60, %v1083_v59 }
 0x83b   :  { %3016 = vmatmul.mubr.msk.bf16.vlgmr.msra.gmra.mxu1 %vm42_vm0, %v1085_v62  ;;  %v3215_v62 = vld [vmem:[%s4037_s4 + $0x18] sm:$0xff]  }
 0x83c   :  { %3043 = vmatprep.mubr.msk.bf16.mxu1 %vm3352_vm1, %v3351_v15  ;;  %3040 = vmatpush3.bf16.msra.mxu1 %v3215_v62 }
 0x83d   :  { %3041 = vmatprep.subr.bf16.mxu1 %v3351_v15 }
 0x840   :  { %3042 = vmatpush3.bf16.msra.mxu1 %v3216_v2 }
 0x8fb   :  { %v1143_v12 = vpop.f32.mrf.mxu1 }
 0x8fc   :  { %v1144_v13 = vadd.f32 %v1143_v12, %v1093_v11 }
 0x8fd   :  { %v3017_v14 = vpop.f32.mrf.mxu1 }
 0x8fe   :  { %v1152_v16 = vmul.f32 0.044715, %v1144_v13  ;;  %v1150_v34 = vmul.f32 0.5, %v1144_v13 }
 0x8ff   :  { %v1146_v17 = vpop.f32.mrf.mxu1 }
 0x900   :  { %v1154_v18 = vmul.f32 %v1152_v16, %v1144_v13  ;;  %v1147_v19 = vadd.f32 %v1146_v17, %v1093_v11 }
 0x901   :  { %v3018_v20 = vpop.f32.mrf.mxu1 }
 0x902   :  { %v1156_v21 = vmul.f32 %v1154_v18, %v1144_v13  ;;  %v1153_v22 = vmul.f32 0.044715, %v1147_v19  ;;  %v1151_v35 = vmul.f32 0.5, %v1147_v19  ;;  %v1321_v18 = vrot.slane %v2748_v9, %v3451_v30 }
 0x904   :  { %v1158_v26 = vadd.f32 %v1156_v21, %v1144_v13  ;;  %v1155_v50 = vmul.f32 %v1153_v22, %v1147_v19  ;;  %v1315_v13 = vrot.slane %v2748_v9, %v3444_v25 }
 0x906   :  { %v1160_v52 = vmul.f32 0.7978846, %v1158_v26  ;;  %v1157_v27 = vmul.f32 %v1155_v50, %v1147_v19  ;;  %v3739_v26 = vld [vmem:[%s4036_s3 + $0x4] sm:$0xf] }
 0x907   :  { %v1333_v50 = vrot.slane %v3739_v26, %v3444_v25 }
 0x908   :  { %3277 = vtanh.f32 %v1160_v52  ;;  %v1159_v29 = vadd.f32 %v1157_v27, %v1147_v19 }
 0x90a   :  { %v1161_v31 = vmul.f32 0.7978846, %v1159_v29 }
 0x90c   :  { %3279 = vtanh.f32 %v1161_v31 }
 0x915   :  { %v3278_v32 = vpop.eup %3277 }
 0x916   :  { %v1164_v0 = vadd.f32 1.0, %v3278_v32 }
 0x918   :  { %v1166_v36 = vmul.f32 %v1164_v0, %v1150_v34 }
 0x919   :  { %v3280_v33 = vpop.eup %3279 }
 0x91a   :  { %v1165_v1 = vadd.f32 1.0, %v3280_v33 }
 0x91c   :  { %v1167_v37 = vmul.f32 %v1165_v1, %v1151_v35 }
 0x91e   :  { %v1168_v38 = vpack.c.bf16 %v1167_v37, %v1166_v36 }
 0x920   :  { %3036 = vmatmul.mubr.bf16.vlgmr.msra.gmra.mxu0 %v1168_v38 }
 0x9e0   :  { %v1271_v42 = vpop.f32.mrf.mxu0 }
 0x9e1   :  { %v1272_v43 = vadd.f32 %v1271_v42, %v1188_v41 }
 0x9e2   :  { %v3037_v44 = vpop.f32.mrf.mxu0 }
 0x9e3   :  { %v3710_v45 = vadd.f32 %v1272_v43, %v3641_v23 }
 0x9e4   :  { %v1274_v46 = vpop.f32.mrf.mxu0 }
 0x9e5   :  { %v1275_v47 = vadd.f32 %v1274_v46, %v1188_v41  ;;  %v1286_v48 = vsel %vm42_vm0, %v3710_v45, 0.0 }
 0x9e6   :  { %1287 = vadd.xlane.f32.xlu1 %v1286_v48  ;;  %v3038_v49 = vpop.f32.mrf.mxu0 }
 0x9e7   :  { %v3715_v51 = vadd.f32 %v1275_v47, %v3646_v28 }
 0x9e9   :  { %v1289_v53 = vsel %vm42_vm0, %v3715_v51, 0.0 }
 0x9ea   :  { %1290 = vadd.xlane.f32.xlu0 %v1289_v53 }
 0xa6f   :  { %v1288_v39 = vpop.xlane.xlu1 %1287 }
 0xa70   :  { %v1292_v54 = vmul.f32 0.03125, %v1288_v39 }
 0xa72   :  { %v1294_v55 = vsub.f32 %v3710_v45, %v1292_v54 }
 0xa73   :  { %v1291_v23 = vpop.xlane.xlu0 %1290 }
 0xa74   :  { %v1293_v56 = vmul.f32 0.03125, %v1291_v23  ;;  %v1296_v57 = vmul.f32 %v1294_v55, %v1294_v55 }
 0xa76   :  { %v1295_v58 = vsub.f32 %v3715_v51, %v1293_v56  ;;  %v1298_v59 = vsel %vm42_vm0, %v1296_v57, 0.0 }
 0xa77   :  { %1299 = vadd.xlane.f32.xlu1 %v1298_v59 }
 0xa78   :  { %v1297_v60 = vmul.f32 %v1295_v58, %v1295_v58 }
 0xa7a   :  { %v1301_v28 = vsel %vm42_vm0, %v1297_v60, 0.0 }
 0xa7b   :  { %1302 = vadd.xlane.f32.xlu0 %v1301_v28 }
 0xb00   :  { %v1300_v3 = vpop.xlane.xlu1 %1299 }
 0xb01   :  { %v1304_v4 = vmul.f32 0.03125, %v1300_v3 }
 0xb03   :  { %v1306_v5 = vadd.f32 1e-05, %v1304_v4 }
 0xb04   :  { %v1303_v6 = vpop.xlane.xlu0 %1302 }
 0xb05   :  { %3281 = vrsqrt.f32 %v1306_v5  ;;  %v1305_v7 = vmul.f32 0.03125, %v1303_v6 }
 0xb07   :  { %v1307_v8 = vadd.f32 1e-05, %v1305_v7 }
 0xb09   :  { %3283 = vrsqrt.f32 %v1307_v8 }
 0xb12   :  { %v3282_v11 = vpop.eup %3281 }
 0xb13   :  { %v1310_v12 = vmul.f32 %v3282_v11, %v1294_v55 }
 0xb15   :  { %v1316_v17 = vmul.f32 %v1315_v13, %v1310_v12 }
 0xb16   :  { %v3284_v14 = vpop.eup %3283 }
 0xb17   :  { %v1311_v16 = vmul.f32 %v3284_v14, %v1295_v58  ;;  %v1322_v20 = vadd.f32 %v1321_v18, %v1316_v17 }
 0xb19   :  { %v1317_v19 = vmul.f32 %v1315_v13, %v1311_v16 }
 0xb1b   :  { %v1323_v21 = vadd.f32 %v1321_v18, %v1317_v19 }
 0xb1d   :  { %v1324_v22 = vpack.c.bf16 %v1323_v21, %v1322_v20 }
 0xb1f   :  { %3044 = vmatmul.mubr.msk.bf16.vlgmr.msra.gmra.mxu1 %vm42_vm0, %v1324_v22 }
 0xbdf   :  { %v1383_v52 = vpop.f32.mrf.mxu1 }
 0xbe0   :  { %v3743_v27 = vadd.f32 %v1383_v52, %v1333_v50 }
 0xbe1   :  { %v3045_v29 = vpop.f32.mrf.mxu1 }
 0xbe2   :  { %1392 = vrot.lane.b32.xlu0 %v3743_v27, %s3353_s20  ;;  %3051 = vmatprep.mubr.msk.f32.mxu1 %vm165_vm2, %v3743_v27 }
 0xbe3   :  { %v1386_v31 = vpop.f32.mrf.mxu1 }
 0xbe4   :  { %v3749_v32 = vadd.f32 %v1386_v31, %v1333_v50 }
 0xbe5   :  { %v3046_v0 = vpop.f32.mrf.mxu1 }
 0xbe6   :  { %1400 = vrot.lane.b32.xlu0 %v3743_v27, %s3355_s22  ;;  %1394 = vrot.lane.b32.xlu1 %v3749_v32, %s3353_s20 }
 0xbea   :  { %1404 = vrot.lane.b32.xlu0 %v3743_v27, %s3356_s23  ;;  %1398 = vrot.lane.b32.xlu1 %v3749_v32, %s3354_s21 }
 0xbee   :  { %1402 = vrot.lane.b32.xlu1 %v3749_v32, %s3355_s22 }
 0xbf2   :  { %1396 = vrot.lane.b32.xlu1 %v3743_v27, %s3354_s21 }
 0xbf6   :  { %1406 = vrot.lane.b32.xlu1 %v3749_v32, %s3356_s23 }
 0xc54   :  { %v3765_v33 = vpop.permute.xlu0 %1392 }
 0xc55   :  { %1491 = vrot.lane.b32.xlu0 %v3765_v33, %s3356_s23 }
 0xc58   :  { %v3769_v34 = vpop.permute.xlu0 %1400  ;;  %v3771_v35 = vpop.permute.xlu1 %1394 }
 0xc59   :  { %3072 = vmatprep.mubr.msk.f32.mxu0 %vm165_vm2, %v3769_v34  ;;  %1493 = vrot.lane.b32.xlu1 %v3771_v35, %s3356_s23 }
 0xc5c   :  { %v3777_v1 = vpop.permute.xlu1 %1398  ;;  %v1405_v41 = vpop.permute.xlu0 %1404 }
 0xc5d   :  { %1580 = vrot.lane.b32.xlu1 %v3777_v1, %s3356_s23 }
 0xc60   :  { %v3781_v36 = vpop.permute.xlu1 %1402 }
 0xc61   :  { %1667 = vrot.lane.b32.xlu0 %v3781_v36, %s3356_s23 }
 0xc64   :  { %v3785_v37 = vpop.permute.xlu1 %1396 }
 0xc65   :  { %1665 = vrot.lane.b32.xlu0 %v3769_v34, %s3356_s23  ;;  %1578 = vrot.lane.b32.xlu1 %v3785_v37, %s3356_s23 }
 0xc68   :  { %v1407_v38 = vpop.permute.xlu1 %1406 }
 0xc69   :  { %3047 = vmatprep.subr.msk.mxu1 %vm165_vm2, %v1407_v38 }
 0xc6a   :  { %3048 = vmatpush3.xpose.msk.msra.mxu1 %vm165_vm2, %v1407_v38 }
 0xc6b   :  { %3049 = vmatprep.subr.msk.mxu1 %vm165_vm2, %v1405_v41 }
 0xc6e   :  { %3050 = vmatpush3.xpose.msk.msra.mxu1 %vm165_vm2, %v1405_v41 }
 0xc71   :  { %3052 = vmatmul.mubr.msk.f32.vlgmr.msra.gmra.mxu1 %vm165_vm2, %v3749_v32 }
 0xc72   :  { %3058 = vmatprep.mubr.msk.f32.mxu1 %vm165_vm2, %v3765_v33 }
 0xcc7   :  { %v1492_v43 = vpop.permute.xlu0 %1491 }
 0xccb   :  { %v1494_v42 = vpop.permute.xlu1 %1493 }
 0xccc   :  { %3054 = vmatprep.subr.msk.mxu1 %vm165_vm2, %v1494_v42 }
 0xccd   :  { %3055 = vmatpush3.xpose.msk.msra.mxu1 %vm165_vm2, %v1494_v42 }
 0xcce   :  { %3056 = vmatprep.subr.msk.mxu1 %vm165_vm2, %v1492_v43 }
 0xccf   :  { %v1581_v44 = vpop.permute.xlu1 %1580 }
 0xcd1   :  { %3057 = vmatpush3.xpose.msk.msra.mxu1 %vm165_vm2, %v1492_v43 }
 0xcd2   :  { %3061 = vmatprep.subr.msk.mxu1 %vm165_vm2, %v1581_v44 }
 0xcd3   :  { %v1668_v46 = vpop.permute.xlu0 %1667 }
 0xcd4   :  { %3059 = vmatmul.mubr.msk.f32.vlgmr.msra.gmra.mxu1 %vm165_vm2, %v3771_v35  ;;  %3068 = vmatprep.subr.msk.mxu0 %vm165_vm2, %v1668_v46 }
 0xcd5   :  { %3062 = vmatpush3.xpose.msk.msra.mxu1 %vm165_vm2, %v1581_v44  ;;  %3065 = vmatprep.mubr.msk.f32.mxu1 %vm165_vm2, %v3785_v37 }
 0xcd6   :  { %3069 = vmatpush3.xpose.msk.msra.mxu0 %vm165_vm2, %v1668_v46 }
 0xcd7   :  { %v1666_v47 = vpop.permute.xlu0 %1665  ;;  %v1579_v48 = vpop.permute.xlu1 %1578 }
 0xcd8   :  { %3063 = vmatprep.subr.msk.mxu1 %vm165_vm2, %v1579_v48  ;;  %3070 = vmatprep.subr.msk.mxu0 %vm165_vm2, %v1666_v47 }
 0xcd9   :  { %3064 = vmatpush3.xpose.msk.msra.mxu1 %vm165_vm2, %v1579_v48 }
 0xcda   :  { %3071 = vmatpush3.xpose.msk.msra.mxu0 %vm165_vm2, %v1666_v47 }
 0xcdc   :  { %3066 = vmatmul.mubr.msk.f32.vlgmr.msra.gmra.mxu1 %vm165_vm2, %v3777_v1 }
 0xcdd   :  { %3073 = vmatmul.mubr.msk.f32.vlgmr.msra.gmra.mxu0 %vm165_vm2, %v3781_v36 }
 0xd31   :  { %v3053_v49 = vpop.f32.mrf.mxu1 }
 0xd32   :  { %v1488_v53 = vadd.f32 %v3053_v49, %v3541_v61 }
 0xd33   :  { %v1482_v39 = vpop.f32.mrf.mxu1 }
 0xd34   :  { %v1483_v54 = vadd.f32 %v1482_v39, %v3546_v63  ;;  %v1755_v55 = vsel %vm510_vm3, %v1488_v53, -inf }
 0xd35   :  { %1756 = vmax.xlane.f32.xlu0 %v1755_v55 }
 0xd36   :  { %v1752_v23 = vsel %vm510_vm3, %v1483_v54, -inf }
 0xd37   :  { %1753 = vmax.xlane.f32.xlu1 %v1752_v23 }
 0xd94   :  { %v3060_v56 = vpop.f32.mrf.mxu1 }
 0xd95   :  { %v1575_v57 = vadd.f32 %v3060_v56, %v3541_v61 }
 0xd96   :  { %v1569_v58 = vpop.f32.mrf.mxu1 }
 0xd97   :  { %v1570_v59 = vadd.f32 %v1569_v58, %v3546_v63  ;;  %v1761_v60 = vsel %vm510_vm3, %v1575_v57, -inf }
 0xd98   :  { %1762 = vmax.xlane.f32.xlu0 %v1761_v60 }
 0xd99   :  { %v1758_v28 = vsel %vm510_vm3, %v1570_v59, -inf }
 0xd9c   :  { %v3067_v62 = vpop.f32.mrf.mxu1  ;;  %1759 = vmax.xlane.f32.xlu0 %v1758_v28 }
 0xd9d   :  { %v1662_v2 = vadd.f32 %v3067_v62, %v3541_v61  ;;  %v3074_v3 = vpop.f32.mrf.mxu0 }
 0xd9e   :  { %v1656_v4 = vpop.f32.mrf.mxu1  ;;  %v1749_v5 = vadd.f32 %v3074_v3, %v3541_v61 }
 0xd9f   :  { %v1657_v6 = vadd.f32 %v1656_v4, %v3546_v63  ;;  %v1743_v7 = vpop.f32.mrf.mxu0  ;;  %v1767_v8 = vsel %vm510_vm3, %v1662_v2, -inf }
 0xda0   :  { %1768 = vmax.xlane.f32.xlu0 %v1767_v8  ;;  %v1744_v9 = vadd.f32 %v1743_v7, %v3546_v63  ;;  %v1773_v12 = vsel %vm510_vm3, %v1749_v5, -inf }
 0xda1   :  { %v1764_v11 = vsel %vm510_vm3, %v1657_v6, -inf }
 0xda2   :  { %1765 = vmax.xlane.f32.xlu1 %v1764_v11  ;;  %v1770_v13 = vsel %vm510_vm3, %v1744_v9, -inf }
 0xda4   :  { %1774 = vmax.xlane.f32.xlu0 %v1773_v12 }
 0xda6   :  { %1771 = vmax.xlane.f32.xlu1 %v1770_v13 }
 0xdb7   :  { %1842 = vrot.lane.b32.xlu1 %v3749_v32, %s3357_s1 }
 0xdba   :  { %1840 = vrot.lane.b32.xlu0 %v3743_v27, %s3357_s1 }
 0xdbb   :  { %1929 = vrot.lane.b32.xlu1 %v3771_v35, %s3357_s1 }
 0xdbe   :  { %2103 = vrot.lane.b32.xlu0 %v3781_v36, %s3357_s1  ;;  %v1757_v61 = vpop.xlane.xlu0 %1756 }
 0xdbf   :  { %1927 = vrot.lane.b32.xlu1 %v3765_v33, %s3357_s1  ;;  %v1777_v63 = vsub.f32 %v1488_v53, %v1757_v61 }
 0xdc0   :  { %v1754_v16 = vpop.xlane.xlu1 %1753 }
 0xdc1   :  { %v1786_v14 = vmul.f32 1.442695, %v1777_v63  ;;  %v1776_v17 = vsub.f32 %v1483_v54, %v1754_v16 }
 0xdc3   :  { %2016 = vrot.lane.b32.xlu1 %v3777_v1, %s3357_s1  ;;  %3285 = vpow2.f32 %v1786_v14  ;;  %v1784_v18 = vmul.f32 1.442695, %v1776_v17 }
 0xdc5   :  { %3287 = vpow2.f32 %v1784_v18 }
 0xdd0   :  { %v3847_v19 = vpop.eup %3285 }
 0xdd1   :  { %v1803_v20 = vsel %vm510_vm3, %v3847_v19, 0.0 }
 0xdd2   :  { %v3851_v21 = vpop.eup %3287 }
 0xdd3   :  { %v1800_v22 = vsel %vm510_vm3, %v3851_v21, 0.0 }
 0xddd   :  { %1804 = vadd.xlane.f32.xlu0 %v1803_v20 }
 0xde7   :  { %1801 = vadd.xlane.f32.xlu1 %v1800_v22 }
 0xe21   :  { %v1763_v50 = vpop.xlane.xlu0 %1762 }
 0xe22   :  { %v1779_v52 = vsub.f32 %v1575_v57, %v1763_v50 }
 0xe24   :  { %v1790_v27 = vmul.f32 1.442695, %v1779_v52 }
 0xe25   :  { %v1760_v29 = vpop.xlane.xlu0 %1759 }
 0xe26   :  { %3289 = vpow2.f32 %v1790_v27  ;;  %v1778_v31 = vsub.f32 %v1570_v59, %v1760_v29 }
 0xe28   :  { %v1788_v32 = vmul.f32 1.442695, %v1778_v31 }
 0xe29   :  { %v1769_v0 = vpop.xlane.xlu0 %1768 }
 0xe2a   :  { %3291 = vpow2.f32 %v1788_v32  ;;  %v1781_v33 = vsub.f32 %v1662_v2, %v1769_v0 }
 0xe2b   :  { %v1766_v35 = vpop.xlane.xlu1 %1765 }
 0xe2c   :  { %v1780_v36 = vsub.f32 %v1657_v6, %v1766_v35  ;;  %v1794_v41 = vmul.f32 1.442695, %v1781_v33 }
 0xe2d   :  { %v1775_v1 = vpop.xlane.xlu0 %1774 }
 0xe2e   :  { %v1783_v38 = vsub.f32 %v1749_v5, %v1775_v1  ;;  %v1792_v46 = vmul.f32 1.442695, %v1780_v36 }
 0xe2f   :  { %v1772_v42 = vpop.xlane.xlu1 %1771 }
 0xe30   :  { %v1798_v43 = vmul.f32 1.442695, %v1783_v38  ;;  %v1782_v44 = vsub.f32 %v1744_v9, %v1772_v42  ;;  %v3217_v38 = vld [vmem:[%s4038_s5 + $0x18] sm:$0xff]   ;;  %v3218_v42 = vld [vmem:[%s4038_s5 + $0x10] sm:$0xff]  }
 0xe31   :  { %v1841_v39 = vpop.permute.xlu0 %1840 }
 0xe32   :  { %3293 = vpow2.f32 %v1798_v43  ;;  %v1796_v47 = vmul.f32 1.442695, %v1782_v44 }
 0xe33   :  { %v3855_v48 = vpop.eup %3289  ;;  %3295 = vpow2.f32 %v1794_v41  ;;  %v1843_v49 = vpop.permute.xlu1 %1842 }
 0xe34   :  { %3297 = vpow2.f32 %v1796_v47  ;;  %3075 = vmatprep.subr.mxu1 %v1843_v49  ;;  %v1809_v53 = vsel %vm510_vm3, %v3855_v48, 0.0 }
 0xe35   :  { %1810 = vadd.xlane.f32.xlu0 %v1809_v53  ;;  %3076 = vmatpush3.msra.mxu1 %v1843_v49  ;;  %3299 = vpow2.f32 %v1792_v46  ;;  %v2104_v5 = vpop.permute.xlu0 %2103 }
 0xe36   :  { %3077 = vmatprep.subr.mxu1 %v1841_v39 }
 0xe37   :  { %v3292_v54 = vpop.eup %3291  ;;  %3078 = vmatpush3.msra.mxu1 %v1841_v39  ;;  %v1930_v55 = vpop.permute.xlu1 %1929 }
 0xe38   :  { %3082 = vmatprep.subr.mxu1 %v1930_v55  ;;  %v1806_v23 = vsel %vm510_vm3, %v3292_v54, 0.0 }
 0xe39   :  { %1807 = vadd.xlane.f32.xlu1 %v1806_v23 }
 0xe3b   :  { %v1928_v56 = vpop.permute.xlu1 %1927 }
 0xe3f   :  { %v3294_v57 = vpop.eup %3293  ;;  %v2017_v58 = vpop.permute.xlu1 %2016 }
 0xe40   :  { %v3860_v59 = vpop.eup %3295  ;;  %3089 = vmatprep.subr.mxu0 %v2017_v58  ;;  %v1821_v60 = vsel %vm510_vm3, %v3294_v57, 0.0 }
 0xe41   :  { %v3298_v28 = vpop.eup %3297  ;;  %1822 = vadd.xlane.f32.xlu0 %v1821_v60  ;;  %3090 = vmatpush3.msra.mxu0 %v2017_v58  ;;  %v1815_v3 = vsel %vm510_vm3, %v3860_v59, 0.0 }
 0xe42   :  { %v1818_v62 = vsel %vm510_vm3, %v3298_v28, 0.0  ;;  %v3300_v2 = vpop.eup %3299 }
 0xe43   :  { %1819 = vadd.xlane.f32.xlu1 %v1818_v62  ;;  %v1812_v4 = vsel %vm510_vm3, %v3300_v2, 0.0 }
 0xe45   :  { %1816 = vadd.xlane.f32.xlu0 %v1815_v3 }
 0xe47   :  { %1813 = vadd.xlane.f32.xlu1 %v1812_v4 }
 0xe58   :  { %2014 = vrot.lane.b32.xlu1 %v3785_v37, %s3357_s1 }
 0xe5b   :  { %2101 = vrot.lane.b32.xlu0 %v3769_v34, %s3357_s1 }
 0xe66   :  { %v1805_v6 = vpop.xlane.xlu0 %1804 }
 0xe67   :  { %3301 = vrcp.f32 %v1805_v6  ;;  %v2285_v6 = vrot.slane %v3739_v26, %v3451_v30 }
 0xe70   :  { %v1802_v7 = vpop.xlane.xlu1 %1801 }
 0xe71   :  { %3303 = vrcp.f32 %v1802_v7 }
 0xe74   :  { %v3302_v8 = vpop.eup %3301 }
 0xe75   :  { %v1833_v12 = vmul.f32 %v3302_v8, %v3847_v19 }
 0xe7e   :  { %v3304_v9 = vpop.eup %3303 }
 0xe7f   :  { %v1832_v11 = vmul.f32 %v3304_v9, %v3851_v21 }
 0xe81   :  { %3079 = vmatprep.mubr.msk.f32.mxu1 %vm510_vm3, %v1832_v11 }
 0xe82   :  { %3080 = vmatmul.mubr.msk.f32.vlgmr.msra.gmra.mxu1 %vm510_vm3, %v1833_v12 }
 0xe83   :  { %3083 = vmatpush3.msra.mxu1 %v1930_v55 }
 0xe84   :  { %3084 = vmatprep.subr.mxu1 %v1928_v56 }
 0xe85   :  { %3085 = vmatpush3.msra.mxu1 %v1928_v56 }
 0xe86   :  { %3096 = vmatprep.subr.mxu1 %v2104_v5 }
 0xebe   :  { %v1811_v34 = vpop.xlane.xlu0 %1810 }
 0xebf   :  { %3305 = vrcp.f32 %v1811_v34 }
 0xec2   :  { %v1808_v37 = vpop.xlane.xlu1 %1807 }
 0xec3   :  { %3307 = vrcp.f32 %v1808_v37 }
 0xeca   :  { %v1823_v13 = vpop.xlane.xlu0 %1822 }
 0xecb   :  { %3309 = vrcp.f32 %v1823_v13 }
 0xecc   :  { %v1820_v61 = vpop.xlane.xlu1 %1819  ;;  %v3306_v14 = vpop.eup %3305 }
 0xecd   :  { %3311 = vrcp.f32 %v1820_v61  ;;  %v1835_v19 = vmul.f32 %v3306_v14, %v3855_v48 }
 0xece   :  { %v1817_v63 = vpop.xlane.xlu0 %1816 }
 0xecf   :  { %3313 = vrcp.f32 %v1817_v63 }
 0xed0   :  { %v3308_v16 = vpop.eup %3307  ;;  %v1814_v17 = vpop.xlane.xlu1 %1813 }
 0xed1   :  { %3315 = vrcp.f32 %v1814_v17  ;;  %v1834_v18 = vmul.f32 %v3308_v16, %v3292_v54 }
 0xed2   :  { %v2102_v21 = vpop.permute.xlu0 %2101 }
 0xed3   :  { %3086 = vmatprep.mubr.msk.f32.mxu1 %vm510_vm3, %v1834_v18 }
 0xed4   :  { %3087 = vmatmul.mubr.msk.f32.vlgmr.msra.gmra.mxu1 %vm510_vm3, %v1835_v19  ;;  %v2015_v20 = vpop.permute.xlu1 %2014 }
 0xed5   :  { %3097 = vmatpush3.msra.mxu1 %v2104_v5  ;;  %3091 = vmatprep.subr.mxu0 %v2015_v20 }
 0xed6   :  { %3098 = vmatprep.subr.mxu1 %v2102_v21  ;;  %3092 = vmatpush3.msra.mxu0 %v2015_v20 }
 0xed7   :  { %3099 = vmatpush3.msra.mxu1 %v2102_v21  ;;  %3103 = vmatprep.subr.bf16.mxu0 %v3351_v15 }
 0xed8   :  { %3111 = vmatprep.subr.bf16.mxu1 %v3351_v15  ;;  %v3310_v22 = vpop.eup %3309 }
 0xed9   :  { %v1839_v27 = vmul.f32 %v3310_v22, %v3294_v57 }
 0xeda   :  { %v3312_v50 = vpop.eup %3311 }
 0xedb   :  { %v1838_v52 = vmul.f32 %v3312_v50, %v3298_v28  ;;  %v3219_v50 = vld [vmem:[%s4039_s6 + $0x18] sm:$0xff]  }
 0xedc   :  { %v3314_v29 = vpop.eup %3313 }
 0xedd   :  { %3100 = vmatprep.mubr.msk.f32.mxu1 %vm510_vm3, %v1838_v52  ;;  %v1837_v0 = vmul.f32 %v3314_v29, %v3860_v59  ;;  %v3220_v52 = vld [vmem:[%s4039_s6 + $0x10] sm:$0xff]  }
 0xede   :  { %v3316_v31 = vpop.eup %3315  ;;  %3101 = vmatmul.mubr.msk.f32.vlgmr.msra.gmra.mxu1 %vm510_vm3, %v1839_v27 }
 0xedf   :  { %v1836_v32 = vmul.f32 %v3316_v31, %v3300_v2  ;;  %3115 = vmatprep.mubr.msk.bf16.mxu1 %vm3352_vm1, %v3351_v15  ;;  %3112 = vmatpush3.bf16.msra.mxu1 %v3219_v50 }
 0xee0   :  { %3113 = vmatprep.subr.bf16.mxu1 %v3351_v15 }
 0xee1   :  { %3093 = vmatprep.mubr.msk.f32.mxu0 %vm510_vm3, %v1836_v32 }
 0xee2   :  { %3094 = vmatmul.mubr.msk.f32.vlgmr.msra.gmra.mxu0 %vm510_vm3, %v1837_v0 }
 0xee3   :  { %3107 = vmatprep.mubr.msk.bf16.mxu0 %vm3352_vm1, %v3351_v15  ;;  %3104 = vmatpush3.bf16.msra.mxu0 %v3217_v38 }
 0xee4   :  { %3105 = vmatprep.subr.bf16.mxu0 %v3351_v15  ;;  %3114 = vmatpush3.bf16.msra.mxu1 %v3220_v52 }
 0xee5   :  { %3139 = vmatprep.subr.bf16.mxu1 %v3351_v15 }
 0xee7   :  { %3106 = vmatpush3.bf16.msra.mxu0 %v3218_v42 }
 0xee8   :  { %3119 = vmatprep.subr.bf16.mxu0 %v3351_v15 }
 0xf42   :  { %v3081_v33 = vpop.f32.mrf.mxu1 }
 0xf44   :  { %v1918_v35 = vpop.f32.mrf.mxu1 }
 0xf94   :  { %v3088_v1 = vpop.f32.mrf.mxu1 }
 0xf96   :  { %v2005_v36 = vpop.f32.mrf.mxu1 }
 0xf97   :  { %v3186_v41 = vpack.i.bf16 %v3088_v1, %v2005_v36 }
 0xf99   :  { %3187 = vrot.lane.b32.xlu1 %v3186_v41, %s3358_s30 }
 0xf9e   :  { %v3102_v43 = vpop.f32.mrf.mxu1 }
 0xfa0   :  { %v2179_v44 = vpop.f32.mrf.mxu1 }
 0xfa1   :  { %v3196_v46 = vpack.i.bf16 %v3102_v43, %v2179_v44 }
 0xfa2   :  { %v3095_v47 = vpop.f32.mrf.mxu0 }
 0xfa3   :  { %3197 = vrot.lane.b32.xlu1 %v3196_v46, %s3360_s0 }
 0xfa4   :  { %v2092_v48 = vpop.f32.mrf.mxu0 }
 0xfa5   :  { %v3191_v49 = vpack.i.bf16 %v3095_v47, %v2092_v48 }
 0xfa7   :  { %3192 = vrot.lane.b32.xlu0 %v3191_v49, %s3359_s12 }
0x100b   :  { %v3188_v53 = vpop.permute.xlu1 %3187 }
0x100c   :  { %v3190_v39 = vunpack.i.h.bf16 %v3188_v53  ;;  %v3189_v54 = vunpack.i.l.bf16 %v3188_v53  ;;  %v3221_v53 = vld [vmem:[%s4040_s7 + $0x78] sm:$0xff]  }
0x100e   :  { %v2213_v58 = vsel %vm165_vm2, %v3081_v33, %v3190_v39  ;;  %v2212_v59 = vsel %vm165_vm2, %v1918_v35, %v3189_v54  ;;  %v2749_v35 = vld [vmem:[%s4035_s2 + $0x6] sm:$0x3]  ;;  %v3222_v39 = vld [vmem:[%s4040_s7 + $0x70] sm:$0xff]   ;;  %v3223_v54 = vld [vmem:[%s4040_s7 + $0x68] sm:$0xff]  }
0x100f   :  { %v2317_v38 = vrot.slane %v2749_v35, %v3444_v25  ;;  %v2323_v44 = vrot.slane %v2749_v35, %v3451_v30 }
0x1015   :  { %v3198_v55 = vpop.permute.xlu1 %3197 }
0x1016   :  { %v3200_v60 = vunpack.i.h.bf16 %v3198_v55  ;;  %v3199_v28 = vunpack.i.l.bf16 %v3198_v55  ;;  %v3224_v55 = vld [vmem:[%s4040_s7 + $0x60] sm:$0xff]  }
0x1019   :  { %v3193_v23 = vpop.permute.xlu0 %3192 }
0x101a   :  { %v3195_v56 = vunpack.i.h.bf16 %v3193_v23  ;;  %v3194_v57 = vunpack.i.l.bf16 %v3193_v23  ;;  %v3225_v23 = vld [vmem:[%s4040_s7 + $0x58] sm:$0xff]  }
0x101c   :  { %v2214_v62 = vsel %vm510_vm3, %v2212_v59, %v3194_v57  ;;  %v2215_v2 = vsel %vm510_vm3, %v2213_v58, %v3195_v56  ;;  %v3226_v56 = vld [vmem:[%s4040_s7 + $0x50] sm:$0xff]   ;;  %v3227_v57 = vld [vmem:[%s4040_s7 + $0x48] sm:$0xff]   ;;  %v3228_v58 = vld [vmem:[%s4040_s7 + $0x40] sm:$0xff]   ;;  %v2335_v59 = vrot.slane %v3739_v26, %v1092_v10 }
0x101d   :  { %v2216_v3 = vsel %vm975_vm4, %v2214_v62, %v3199_v28  ;;  %v2217_v4 = vsel %vm975_vm4, %v2215_v2, %v3200_v60 }
0x101e   :  { %v2218_v5 = vpack.c.bf16 %v2217_v4, %v2216_v3 }
0x1020   :  { %3108 = vmatmul.mubr.msk.bf16.vlgmr.msra.gmra.mxu0 %vm42_vm0, %v2218_v5 }
0x1021   :  { %3135 = vmatprep.mubr.msk.bf16.mxu0 %vm3352_vm1, %v3351_v15  ;;  %3120 = vmatpush3.bf16.msra.mxu0 %v3221_v53 }
0x1022   :  { %3121 = vmatprep.subr.bf16.mxu0 %v3351_v15 }
0x1025   :  { %3122 = vmatpush3.bf16.msra.mxu0 %v3222_v39 }
0x1026   :  { %3123 = vmatprep.subr.bf16.mxu0 %v3351_v15 }
0x1029   :  { %3124 = vmatpush3.bf16.msra.mxu0 %v3223_v54 }
0x102a   :  { %3125 = vmatprep.subr.bf16.mxu0 %v3351_v15 }
0x102d   :  { %3126 = vmatpush3.bf16.msra.mxu0 %v3224_v55 }
0x102e   :  { %3127 = vmatprep.subr.bf16.mxu0 %v3351_v15 }
0x1031   :  { %3128 = vmatpush3.bf16.msra.mxu0 %v3225_v23  ;;  %v3234_v23 = vld [vmem:[%s4041_s8 + $0x10] sm:$0xff]  }
0x1032   :  { %3129 = vmatprep.subr.bf16.mxu0 %v3351_v15 }
0x1035   :  { %3130 = vmatpush3.bf16.msra.mxu0 %v3226_v56  ;;  %v2630_v56 = vsel %vm42_vm0, %v3234_v23, 0 }
0x1036   :  { %3131 = vmatprep.subr.bf16.mxu0 %v3351_v15 }
0x1039   :  { %3132 = vmatpush3.bf16.msra.mxu0 %v3227_v57  ;;  %v3235_v57 = vld [vmem:[%s4041_s8 + $0x8] sm:$0xff]  }
0x103a   :  { %3133 = vmatprep.subr.bf16.mxu0 %v3351_v15 }
0x103d   :  { %3134 = vmatpush3.bf16.msra.mxu0 %v3228_v58  ;;  %v2627_v58 = vsel %vm42_vm0, %v3235_v57, 0 }
0x10e0   :  { %v2273_v7 = vpop.f32.mrf.mxu0 }
0x10e1   :  { %v2280_v8 = vadd.f32 %v2273_v7, %v3710_v45 }
0x10e2   :  { %v3109_v9 = vpop.f32.mrf.mxu0 }
0x10e3   :  { %v3912_v11 = vadd.f32 %v2285_v6, %v2280_v8 }
0x10e4   :  { %v2276_v12 = vpop.f32.mrf.mxu0 }
0x10e5   :  { %v2281_v34 = vadd.f32 %v2276_v12, %v3715_v51  ;;  %v2288_v37 = vsel %vm42_vm0, %v3912_v11, 0.0 }
0x10e6   :  { %2289 = vadd.xlane.f32.xlu0 %v2288_v37  ;;  %v3110_v13 = vpop.f32.mrf.mxu0 }
0x10e7   :  { %v3917_v61 = vadd.f32 %v2285_v6, %v2281_v34 }
0x10e9   :  { %v2291_v63 = vsel %vm42_vm0, %v3917_v61, 0.0 }
0x10ea   :  { %2292 = vadd.xlane.f32.xlu1 %v2291_v63 }
0x116f   :  { %v2290_v14 = vpop.xlane.xlu0 %2289 }
0x1170   :  { %v2294_v16 = vmul.f32 0.03125, %v2290_v14 }
0x1172   :  { %v2296_v45 = vsub.f32 %v3912_v11, %v2294_v16 }
0x1173   :  { %v2293_v17 = vpop.xlane.xlu1 %2292 }
0x1174   :  { %v2295_v18 = vmul.f32 0.03125, %v2293_v17  ;;  %v2298_v19 = vmul.f32 %v2296_v45, %v2296_v45 }
0x1176   :  { %v2297_v51 = vsub.f32 %v3917_v61, %v2295_v18  ;;  %v2300_v20 = vsel %vm42_vm0, %v2298_v19, 0.0 }
0x1177   :  { %2301 = vadd.xlane.f32.xlu0 %v2300_v20 }
0x1178   :  { %v2299_v21 = vmul.f32 %v2297_v51, %v2297_v51 }
0x117a   :  { %v2303_v22 = vsel %vm42_vm0, %v2299_v21, 0.0  ;;  %v2431_v21 = vrot.slane %v3739_v26, %v1187_v40  ;;  %v2645_v40 = vsel %vm42_vm0, %v3229_v24, 0  ;;  %v3230_v26 = vld [vmem:[%s4041_s8 + $0x30] sm:$0xff]  }
0x117b   :  { %2304 = vadd.xlane.f32.xlu0 %v2303_v22 }
0x1200   :  { %v2302_v27 = vpop.xlane.xlu0 %2301 }
0x1201   :  { %v2306_v29 = vmul.f32 0.03125, %v2302_v27 }
0x1203   :  { %v2308_v31 = vadd.f32 1e-05, %v2306_v29 }
0x1204   :  { %v2305_v32 = vpop.xlane.xlu0 %2304 }
0x1205   :  { %3317 = vrsqrt.f32 %v2308_v31  ;;  %v2307_v0 = vmul.f32 0.03125, %v2305_v32 }
0x1207   :  { %v2309_v33 = vadd.f32 1e-05, %v2307_v0 }
0x1209   :  { %3319 = vrsqrt.f32 %v2309_v33 }
0x1212   :  { %v3318_v1 = vpop.eup %3317 }
0x1213   :  { %v2312_v36 = vmul.f32 %v3318_v1, %v2296_v45 }
0x1215   :  { %v2318_v43 = vmul.f32 %v2317_v38, %v2312_v36  ;;  %v3232_v36 = vld [vmem:[%s4041_s8 + $0x20] sm:$0xff]  }
0x1216   :  { %v3320_v41 = vpop.eup %3319 }
0x1217   :  { %v2313_v42 = vmul.f32 %v3320_v41, %v2297_v51  ;;  %v2324_v47 = vadd.f32 %v2323_v44, %v2318_v43  ;;  %v3233_v41 = vld [vmem:[%s4041_s8 + $0x18] sm:$0xff]  }
0x1219   :  { %v2319_v46 = vmul.f32 %v2317_v38, %v2313_v42  ;;  %v2636_v38 = vsel %vm42_vm0, %v3232_v36, 0  ;;  %v2633_v42 = vsel %vm42_vm0, %v3233_v41, 0 }
0x121b   :  { %v2325_v48 = vadd.f32 %v2323_v44, %v2319_v46 }
0x121d   :  { %v2326_v49 = vpack.c.bf16 %v2325_v48, %v2324_v47 }
0x121f   :  { %3116 = vmatmul.mubr.msk.bf16.vlgmr.msra.gmra.mxu1 %vm42_vm0, %v2326_v49 }
0x1220   :  { %3155 = vmatprep.mubr.msk.bf16.mxu1 %vm3352_vm1, %v3351_v15  ;;  %3140 = vmatpush3.bf16.xpose.msra.mxu1 %v2645_v40 }
0x1221   :  { %3141 = vmatprep.subr.bf16.mxu1 %v3351_v15 }
0x12df   :  { %v2385_v60 = vpop.f32.mrf.mxu1 }
0x12e0   :  { %v2386_v28 = vadd.f32 %v2385_v60, %v2335_v59 }
0x12e1   :  { %v3117_v62 = vpop.f32.mrf.mxu1 }
0x12e2   :  { %v2394_v2 = vmul.f32 0.044715, %v2386_v28  ;;  %v2392_v45 = vmul.f32 0.5, %v2386_v28 }
0x12e3   :  { %v2388_v3 = vpop.f32.mrf.mxu1 }
0x12e4   :  { %v2396_v4 = vmul.f32 %v2394_v2, %v2386_v28  ;;  %v2389_v5 = vadd.f32 %v2388_v3, %v2335_v59  ;;  %v3236_v59 = vld [vmem:[%s4041_s8] sm:$0xff]  }
0x12e5   :  { %v3118_v6 = vpop.f32.mrf.mxu1  ;;  %v2624_v60 = vsel %vm42_vm0, %v3236_v59, 0 }
0x12e6   :  { %v2398_v7 = vmul.f32 %v2396_v4, %v2386_v28  ;;  %v2395_v8 = vmul.f32 0.044715, %v2389_v5  ;;  %v2393_v17 = vmul.f32 0.5, %v2389_v5  ;;  %v2820_v6 = vld [vmem:[%s4035_s2 + $0x8] sm:$0x3] }
0x12e8   :  { %v2400_v9 = vadd.f32 %v2398_v7, %v2386_v28  ;;  %v2397_v12 = vmul.f32 %v2395_v8, %v2389_v5  ;;  %v2554_v8 = vrot.slane %v2820_v6, %v3444_v25 }
0x12ea   :  { %v2402_v34 = vmul.f32 0.7978846, %v2400_v9  ;;  %v2399_v37 = vmul.f32 %v2397_v12, %v2389_v5 }
0x12ec   :  { %3321 = vtanh.f32 %v2402_v34  ;;  %v2401_v13 = vadd.f32 %v2399_v37, %v2389_v5  ;;  %v2560_v37 = vrot.slane %v2820_v6, %v3451_v30 }
0x12ee   :  { %v2403_v63 = vmul.f32 0.7978846, %v2401_v13 }
0x12f0   :  { %3323 = vtanh.f32 %v2403_v63 }
0x12f9   :  { %v3322_v14 = vpop.eup %3321 }
0x12fa   :  { %v2406_v10 = vadd.f32 1.0, %v3322_v14 }
0x12fc   :  { %v2408_v19 = vmul.f32 %v2406_v10, %v2392_v45 }
0x12fd   :  { %v3324_v16 = vpop.eup %3323 }
0x12fe   :  { %v2407_v18 = vadd.f32 1.0, %v3324_v16 }
0x1300   :  { %v2409_v51 = vmul.f32 %v2407_v18, %v2393_v17 }
0x1302   :  { %v2410_v20 = vpack.c.bf16 %v2409_v51, %v2408_v19 }
0x1304   :  { %3136 = vmatmul.mubr.bf16.vlgmr.msra.gmra.mxu0 %v2410_v20 }
0x13c4   :  { %v2514_v22 = vpop.f32.mrf.mxu0 }
0x13c5   :  { %v2515_v50 = vadd.f32 %v2514_v22, %v2431_v21 }
0x13c6   :  { %v3137_v52 = vpop.f32.mrf.mxu0 }
0x13c7   :  { %v2521_v27 = vadd.f32 %v2515_v50, %v3912_v11  ;;  %v2642_v11 = vsel %vm42_vm0, %v3230_v26, 0 }
0x13c8   :  { %v2517_v29 = vpop.f32.mrf.mxu0  ;;  %3142 = vmatpush3.bf16.xpose.msra.mxu1 %v2642_v11 }
0x13c9   :  { %v2518_v31 = vadd.f32 %v2517_v29, %v2431_v21  ;;  %v2525_v32 = vsel %vm42_vm0, %v2521_v27, 0.0  ;;  %3143 = vmatprep.subr.bf16.mxu1 %v3351_v15 }
0x13ca   :  { %2526 = vadd.xlane.f32.xlu0 %v2525_v32  ;;  %v3138_v0 = vpop.f32.mrf.mxu0 }
0x13cb   :  { %v2522_v33 = vadd.f32 %v2518_v31, %v3917_v61  ;;  %v3231_v61 = vld [vmem:[%s4041_s8 + $0x28] sm:$0xff]   ;;  %s3361_s8 = smov [#allocation2]  }
0x13cc   :  { %v2639_v1 = vsel %vm42_vm0, %v3231_v61, 0  ;;  %s2695_s19 = sshll.u32 %s3361_s8, 4  ;;  %s2696_s19 = int_to_ptr.vmem [resolvable:$true] %s2695_s19 }
0x13cd   :  { %v2528_v35 = vsel %vm42_vm0, %v2522_v33, 0.0  ;;  %s3329_s2 = scalar_lea.vmem %s2696_s19, 256  ;;  %p3334_p1 = scmp.lt.s32.totalorder %s2696_s19, %s2696_s19 }
0x13ce   :  { %2529 = vadd.xlane.f32.xlu1 %v2528_v35  ;;  %p3330_p0 = scmp.ne.s32.totalorder %s2696_s19, %s3329_s2  ;;  %p3335_p2 = scmp.lt.s32.totalorder %s3329_s2, %s3329_s2 }
0x13d0   :  { %3144 = vmatpush3.bf16.xpose.msra.mxu1 %v2639_v1  ;;  %p3336_p3 = por %p3335_p2, %p3334_p1 }
0x13d1   :  { %3145 = vmatprep.subr.bf16.mxu1 %v3351_v15 }
0x13d2   :  { %p3337_p4 = pnand %p3336_p3, %p3330_p0 }
0x13d8   :  { %3146 = vmatpush3.bf16.xpose.msra.mxu1 %v2636_v38 }
0x13d9   :  { %3147 = vmatprep.subr.bf16.mxu1 %v3351_v15 }
0x13e0   :  { %3148 = vmatpush3.bf16.xpose.msra.mxu1 %v2633_v42 }
0x13e1   :  { %3149 = vmatprep.subr.bf16.mxu1 %v3351_v15 }
0x13e8   :  { %3150 = vmatpush3.bf16.xpose.msra.mxu1 %v2630_v56 }
0x13e9   :  { %3151 = vmatprep.subr.bf16.mxu1 %v3351_v15 }
0x13f0   :  { %3152 = vmatpush3.bf16.xpose.msra.mxu1 %v2627_v58 }
0x13f1   :  { %3153 = vmatprep.subr.bf16.mxu1 %v3351_v15 }
0x13f8   :  { %3154 = vmatpush3.bf16.xpose.msra.mxu1 %v2624_v60 }
0x1453   :  { %v2527_v43 = vpop.xlane.xlu0 %2526 }
0x1454   :  { %v2531_v44 = vmul.f32 0.03125, %v2527_v43 }
0x1456   :  { %v2533_v46 = vsub.f32 %v2521_v27, %v2531_v44 }
0x1457   :  { %v2530_v47 = vpop.xlane.xlu1 %2529 }
0x1458   :  { %v2532_v48 = vmul.f32 0.03125, %v2530_v47  ;;  %v2535_v49 = vmul.f32 %v2533_v46, %v2533_v46 }
0x145a   :  { %v2534_v53 = vsub.f32 %v2522_v33, %v2532_v48  ;;  %v2537_v39 = vsel %vm42_vm0, %v2535_v49, 0.0 }
0x145b   :  { %2538 = vadd.xlane.f32.xlu0 %v2537_v39 }
0x145c   :  { %v2536_v54 = vmul.f32 %v2534_v53, %v2534_v53 }
0x145e   :  { %v2540_v55 = vsel %vm42_vm0, %v2536_v54, 0.0 }
0x145f   :  { %2541 = vadd.xlane.f32.xlu1 %v2540_v55 }
0x14e4   :  { %v2539_v28 = vpop.xlane.xlu0 %2538 }
0x14e5   :  { %v2543_v62 = vmul.f32 0.03125, %v2539_v28 }
0x14e7   :  { %v2545_v2 = vadd.f32 1e-05, %v2543_v62 }
0x14e8   :  { %v2542_v3 = vpop.xlane.xlu1 %2541 }
0x14e9   :  { %3325 = vrsqrt.f32 %v2545_v2  ;;  %v2544_v4 = vmul.f32 0.03125, %v2542_v3 }
0x14eb   :  { %v2546_v5 = vadd.f32 1e-05, %v2544_v4 }
0x14ed   :  { %3327 = vrsqrt.f32 %v2546_v5 }
0x14f6   :  { %v3326_v15 = vpop.eup %3325 }
0x14f7   :  { %v2549_v7 = vmul.f32 %v3326_v15, %v2533_v46 }
0x14f9   :  { %v2555_v34 = vmul.f32 %v2554_v8, %v2549_v7 }
0x14fa   :  { %v3328_v9 = vpop.eup %3327 }
0x14fb   :  { %v2550_v12 = vmul.f32 %v3328_v9, %v2534_v53  ;;  %v2561_v63 = vadd.f32 %v2560_v37, %v2555_v34 }
0x14fd   :  { %v2556_v13 = vmul.f32 %v2554_v8, %v2550_v12 }
0x14ff   :  { %v2562_v14 = vadd.f32 %v2560_v37, %v2556_v13 }
0x1501   :  { %v2563_v10 = vpack.c.bf16 %v2562_v14, %v2561_v63 }
0x1503   :  { %3156 = vmatmul.mubr.msk.bf16.vlgmr.msra.gmra.mxu1 %vm42_vm0, %v2563_v10 }
0x15c3   :  { %v2681_v16 = vpop.f32.mrf.mxu1 }
0x15c4   :  { %2688 = vst [vmem:[#allocation2] sm:$0xff] %v2681_v16 }
0x15c5   :  { %v3157_v45 = vpop.f32.mrf.mxu1 }
0x15c7   :  { %v2684_v17 = vpop.f32.mrf.mxu1 }
0x15c8   :  { %2689 = vst [vmem:[#allocation2 + $0x8] sm:$0xff] %v2684_v17 }
0x15c9   :  { %v3158_v25 = vpop.f32.mrf.mxu1 }
0x15ca   :  { %3340 = shalt.err (!%p3337_p4)
}
0x15cb   :  { %s3362_s24 = smov 128  }
0x15cc   :  { %2701 = dma.vmem_to_hbm [thread:$0]  %s2696_s19, 256, %s4042_s9, [#allocation3], %s3362_s24, %s3362_s24, %s3358_s30  }
0x15cd   :  { %3349 = dma.done.wait [#allocation3], 256  }
0x15ce   :  { %3350 = vsyncadd [#allocation3], 4294967040 }
0x15cf   :  { %2705 = vsyncpa [#allocation3], 1 }

</bundles_post_ra>
